<compile_context>
chip_gen: v7x
topology: tpu7x:2x2x1
jax: 0.10.0
libtpu: 0.0.40
codegen_flags: <defaults>
</compile_context>

<pallas_src>
import functools

import jax
import jax.numpy as jnp
from jax import lax
from jax.experimental import pallas as pl
from jax.experimental.pallas import tpu as pltpu


LANE = 128  # output channels padded to a multiple of this (lane-dense stores)


def _round_up(x, m):
    return ((x + m - 1) // m) * m


def _vmem_cap_bytes():
    try:
        return int(pltpu.get_tpu_info().vmem_capacity_bytes)
    except Exception:
        return 64 << 20  # conservative: v7x per-TensorCore VMEM


# ----------------------------------------------------------------------------
# The fused BasicBlock kernel (one batch image per grid step).
#   xph_ref : (1, s*s*Hp, Wp, Cin) bf16  padded input, decomposed by stride phase
#   w1_ref  : (9, Cin, Cp) bf16          conv1 weights (tap-major)
#   w2_ref  : (9, Cp,  Cp) bf16          conv2 weights
#   wd_ref  : (Cin, Cp)    bf16          1x1 shortcut weights (eye-padded for identity)
#   bn_ref  : (6, Cp)      f32           [s1, b1, s2, b2, sd, bd] folded BN params
#   out_ref : (1, Ho, Wo, Cp) f32        final block output
#   out1p_ref: VMEM (Ho+2, Wo+2, Cp) bf16 scratch — conv1 output with zero halo
# ----------------------------------------------------------------------------
def _make_block_kernel(Ho, Wo, Hp, stride, cin, cp):
    M = Ho * Wo

    def tap(dh, dw):
        # padded-coordinate tap (dh, dw) -> (row offset into phase-stacked rows, col)
        row = ((dh % stride) * stride + (dw % stride)) * Hp + dh // stride
        col = dw // stride
        return row, col

    def kernel(xph_ref, w1_ref, w2_ref, wd_ref, bn_ref, out_ref, out1p_ref):
        # ---- conv1 (3x3, stride) + bn1 + LeakyReLU(0.01): 9 shifted MXU matmuls ----
        acc = None
        for dh in range(3):
            for dw in range(3):
                r0, c0 = tap(dh, dw)
                win = xph_ref[0, r0:r0 + Ho, c0:c0 + Wo, :].reshape(M, cin)
                d = jnp.dot(win, w1_ref[dh * 3 + dw],
                            preferred_element_type=jnp.float32)
                acc = d if acc is None else acc + d
        y1 = acc * bn_ref[0:1, :] + bn_ref[1:2, :]
        y1 = jnp.where(y1 > 0, y1, 0.01 * y1)          # nn.LeakyReLU default slope

        # stage conv1 output (zero halo) in VMEM: conv1->conv2 fused, no HBM round trip
        out1p_ref[...] = jnp.zeros((Ho + 2, Wo + 2, cp), out1p_ref.dtype)
        out1p_ref[1:Ho + 1, 1:Wo + 1, :] = (
            y1.reshape(Ho, Wo, cp).astype(out1p_ref.dtype))

        # ---- conv2 (3x3, stride 1) + bn2 ----
        acc2 = None
        for dh in range(3):
            for dw in range(3):
                win = out1p_ref[dh:dh + Ho, dw:dw + Wo, :].reshape(M, cp)
                d = jnp.dot(win, w2_ref[dh * 3 + dw],
                            preferred_element_type=jnp.float32)
                acc2 = d if acc2 is None else acc2 + d
        y2 = acc2 * bn_ref[2:3, :] + bn_ref[3:4, :]

        # ---- shortcut: 1x1/stride conv + BN (downsample) or identity via eye weight ----
        r0, c0 = tap(1, 1)                               # pad-coord (1,1) == x[s*i, s*j]
        sc_in = xph_ref[0, r0:r0 + Ho, c0:c0 + Wo, :].reshape(M, cin)
        sc = jnp.dot(sc_in, wd_ref[...], preferred_element_type=jnp.float32)
        sc = sc * bn_ref[4:5, :] + bn_ref[5:6, :]

        out = jnp.maximum(y2 + sc, 0.0)                  # residual add + ReLU
        out_ref[0] = out.reshape(Ho, Wo, cp).astype(out_ref.dtype)

    return kernel


# ----------------------------------------------------------------------------
# Wrapper-side data prep (XLA): phase decomposition, weight/BN packing.
# ----------------------------------------------------------------------------
def _build_phases(x_nhwc_bf16, stride):
    """Pad (1 px) and split by stride phase so every 3x3 tap is a contiguous window.
       (N, H, W, C) -> (N, s*s*Hp, Wp, C)."""
    N, H, W, C = x_nhwc_bf16.shape
    Ho = (H + 2 - 3) // stride + 1
    Wo = (W + 2 - 3) // stride + 1
    Hp = Ho + 2 // stride
    Wp = Wo + 2 // stride
    xp = jnp.pad(x_nhwc_bf16, ((0, 0), (1, 1), (1, 1), (0, 0)))
    phases = []
    for ph in range(stride):
        for pw in range(stride):
            p = xp[:, ph::stride, pw::stride, :][:, :Hp, :Wp, :]
            dh, dw = Hp - p.shape[1], Wp - p.shape[2]
            if dh or dw:
                p = jnp.pad(p, ((0, 0), (0, dh), (0, dw), (0, 0)))
            phases.append(p)
    xph = jnp.concatenate(phases, axis=1)
    return xph, Ho, Wo, Hp, Wp


def _prep_conv3x3(w_oihw, cin_p, cout_p):
    """PyTorch (O, I, 3, 3) -> (9, cin_p, cout_p) bf16, tap-major (dh*3+dw)."""
    O, I, kh, kw = w_oihw.shape
    w = jnp.transpose(w_oihw, (2, 3, 1, 0)).reshape(kh * kw, I, O)
    w = jnp.pad(w, ((0, 0), (0, cin_p - I), (0, cout_p - O)))
    return w.astype(jnp.bfloat16)


def _fold_bn(bn, cp, eps=1e-5):
    """Eval-mode BatchNorm folded to per-channel (scale, bias), padded to cp."""
    s = bn["gamma"] / jnp.sqrt(bn["running_var"] + eps)
    b = bn["beta"] - bn["running_mean"] * s
    return (jnp.pad(s, (0, cp - s.shape[0])).astype(jnp.float32),
            jnp.pad(b, (0, cp - b.shape[0])).astype(jnp.float32))


def _prep_shortcut(params, cin, cout, cp):
    """1x1 downsample conv + BN, or identity expressed as an eye-weight 1x1 conv."""
    if params.get("Wd") is not None:
        wd = jnp.transpose(params["Wd"][:, :, 0, 0], (1, 0))        # (I, O)
        wd = jnp.pad(wd, ((0, 0), (0, cp - cout)))
        sd, bd = _fold_bn(params["bnd"], cp)
    else:
        wd = jnp.pad(jnp.eye(cin, dtype=jnp.float32), ((0, 0), (0, cp - cin)))
        sd = jnp.ones((cp,), jnp.float32)
        bd = jnp.zeros((cp,), jnp.float32)
    return wd.astype(jnp.bfloat16), sd, bd


# ----------------------------------------------------------------------------
# BasicBlock forward (NCHW in / NCHW out, like the PyTorch module)
# ----------------------------------------------------------------------------
def basic_block_forward(x_nchw, params, stride):
    x = jnp.transpose(x_nchw, (0, 2, 3, 1))                 # NHWC
    N, H, W, Cin = x.shape
    Cout = params["W1"].shape[0]
    Cp = _round_up(Cout, LANE)                               # lane-dense channel pad

    xph, Ho, Wo, Hp, Wp = _build_phases(x.astype(jnp.bfloat16), stride)
    PH = stride * stride * Hp

    w1 = _prep_conv3x3(params["W1"], Cin, Cp)                # (9, Cin, Cp)
    w2 = _prep_conv3x3(params["W2"], Cp, Cp)                 # (9, Cp,  Cp)
    wd, sd, bd = _prep_shortcut(params, Cin, Cout, Cp)       # (Cin, Cp), (Cp,), (Cp,)
    s1, b1 = _fold_bn(params["bn1"], Cp)
    s2, b2 = _fold_bn(params["bn2"], Cp)
    bn_all = jnp.stack([s1, b1, s2, b2, sd, bd])             # (6, Cp) f32

    # VMEM budget: double-buffered blocks + scratch + f32 temps, capped to the chip.
    M = Ho * Wo
    block_bytes = (PH * Wp * Cin * 2 + 9 * Cin * Cp * 2 + 9 * Cp * Cp * 2
                   + Cin * Cp * 2 + 6 * Cp * 4 + M * Cp * 4)
    scratch_bytes = (Ho + 2) * (Wo + 2) * Cp * 2
    temp_bytes = 4 * M * Cp * 4
    needed = 2 * block_bytes + scratch_bytes + temp_bytes + (4 << 20)
    vmem_limit = int(min(max(needed, 32 << 20), 0.9 * _vmem_cap_bytes()))
    # TODO(synk): if `needed` exceeds the cap (very large spatial dims), switch to
    # output-row-band tiling with a 1-row out1 halo instead of whole images.

    kernel = _make_block_kernel(Ho, Wo, Hp, stride, Cin, Cp)
    out = pl.pallas_call(
        kernel,
        out_shape=jax.ShapeDtypeStruct((N, Ho, Wo, Cp), jnp.float32),
        grid=(N,),  # TODO(synk): N==1 leaves one v7x TensorCore idle; add a band axis.
        in_specs=[
            pl.BlockSpec((1, PH, Wp, Cin), lambda n: (n, 0, 0, 0)),
            pl.BlockSpec((9, Cin, Cp), lambda n: (0, 0, 0)),   # constant -> DMA'd once
            pl.BlockSpec((9, Cp, Cp), lambda n: (0, 0, 0)),
            pl.BlockSpec((Cin, Cp), lambda n: (0, 0)),
            pl.BlockSpec((6, Cp), lambda n: (0, 0)),
        ],
        out_specs=pl.BlockSpec((1, Ho, Wo, Cp), lambda n: (n, 0, 0, 0)),
        scratch_shapes=[pltpu.VMEM((Ho + 2, Wo + 2, Cp), jnp.bfloat16)],
        compiler_params=pltpu.CompilerParams(
            dimension_semantics=("parallel",),
            vmem_limit_bytes=vmem_limit,
        ),
    )(xph, w1, w2, wd, bn_all)

    out = out[..., :Cout]
    return jnp.transpose(out, (0, 3, 1, 2))                  # back to NCHW


# ----------------------------------------------------------------------------
# Pure-JAX reference (f32, HIGHEST precision) for correctness check
# ----------------------------------------------------------------------------
def _ref_conv(x_nhwc, w_oihw, stride, pad):
    w_hwio = jnp.transpose(w_oihw, (2, 3, 1, 0))
    return lax.conv_general_dilated(
        x_nhwc, w_hwio, (stride, stride), [(pad, pad), (pad, pad)],
        dimension_numbers=("NHWC", "HWIO", "NHWC"),
        precision=lax.Precision.HIGHEST,
    )


def _ref_bn(x, bn, eps=1e-5):
    s = bn["gamma"] / jnp.sqrt(bn["running_var"] + eps)
    return x * s + (bn["beta"] - bn["running_mean"] * s)


def ref_forward(x_nchw, params, stride):
    x = jnp.transpose(x_nchw, (0, 2, 3, 1)).astype(jnp.float32)
    out = _ref_conv(x, params["W1"], stride, 1)
    out = _ref_bn(out, params["bn1"])
    out = jnp.where(out > 0, out, 0.01 * out)
    out = _ref_conv(out, params["W2"], 1, 1)
    out = _ref_bn(out, params["bn2"])
    if params.get("Wd") is not None:
        sc = _ref_conv(x, params["Wd"], stride, 0)
        sc = _ref_bn(sc, params["bnd"])
    else:
        sc = x
    out = jnp.maximum(sc + out, 0.0)
    return jnp.transpose(out, (0, 3, 1, 2))


# ----------------------------------------------------------------------------
def _init_bn(key, c):
    k1, k2, k3, k4 = jax.random.split(key, 4)
    return {
        "gamma": jax.random.uniform(k1, (c,), jnp.float32, 0.5, 1.5),
        "beta": jax.random.normal(k2, (c,), jnp.float32) * 0.1,
        "running_mean": jax.random.normal(k3, (c,), jnp.float32) * 0.1,
        "running_var": jax.random.uniform(k4, (c,), jnp.float32, 0.5, 1.5),
    }


def _make_params(key, in_chan, out_chan, stride):
    kw1, kw2, kwd, kb1, kb2, kbd = jax.random.split(key, 6)
    params = {
        "W1": jax.random.normal(kw1, (out_chan, in_chan, 3, 3), jnp.float32) * 0.1,
        "W2": jax.random.normal(kw2, (out_chan, out_chan, 3, 3), jnp.float32) * 0.1,
        "bn1": _init_bn(kb1, out_chan),
        "bn2": _init_bn(kb2, out_chan),
        "Wd": None,
    }
    if in_chan != out_chan or stride != 1:   # downsample branch, as in the module
        params["Wd"] = jax.random.normal(
            kwd, (out_chan, in_chan, 1, 1), jnp.float32) * 0.1
        params["bnd"] = _init_bn(kbd, out_chan)
    return params


def _check(out, ref, name):
    # bf16 MXU operands / bf16 staged intermediate vs f32 HIGHEST reference
    max_err = float(jnp.max(jnp.abs(out - ref)))
    rel = float(jnp.linalg.norm(out - ref) / (jnp.linalg.norm(ref) + 1e-6))
    assert max_err < 2e-1 and rel < 4e-2, (name, max_err, rel)


if __name__ == "__main__":
    key = jax.random.PRNGKey(0)
    k0, k1, k2, k3 = jax.random.split(key, 4)

    # case 1: downsample block (stride 2, channel change)
    N, Cin, Cout, H, W, stride = 2, 8, 16, 16, 16, 2
    x = jax.random.normal(k0, (N, Cin, H, W), jnp.float32)
    params = _make_params(k1, Cin, Cout, stride)
    fwd = jax.jit(functools.partial(basic_block_forward, stride=stride))
    out = jax.block_until_ready(fwd(x, params))
    assert out.shape == (N, Cout, H // stride, W // stride), out.shape
    ref = jax.block_until_ready(ref_forward(x, params, stride))
    _check(out, ref, "downsample")

    # case 2: identity-shortcut block (stride 1, same channels)
    N2, C2, H2, W2, stride2 = 2, 16, 16, 16, 1
    x2 = jax.random.normal(k2, (N2, C2, H2, W2), jnp.float32)
    params2 = _make_params(k3, C2, C2, stride2)
    fwd2 = jax.jit(functools.partial(basic_block_forward, stride=stride2))
    out2 = jax.block_until_ready(fwd2(x2, params2))
    assert out2.shape == (N2, C2, H2, W2), out2.shape
    ref2 = jax.block_until_ready(ref_forward(x2, params2, stride2))
    _check(out2, ref2, "identity")

    print("KERNEL_OK")
</pallas_src>

<mosaic_0001>
module attributes {stable_mosaic.version = 11 : i64} {
  func.func @kernel(%arg0: i32, %arg1: memref<1x36x9x8xbf16, #tpu.memory_space<vmem>>, %arg2: memref<9x8x128xbf16, #tpu.memory_space<vmem>>, %arg3: memref<9x128x128xbf16, #tpu.memory_space<vmem>>, %arg4: memref<8x128xbf16, #tpu.memory_space<vmem>>, %arg5: memref<6x128xf32, #tpu.memory_space<vmem>>, %arg6: memref<1x8x8x128xf32, #tpu.memory_space<vmem>>, %arg7: memref<10x10x128xbf16, #tpu.memory_space<vmem>>) attributes {dimension_semantics = [#tpu.dimension_semantics<parallel>], iteration_bounds = array<i64: 2>, scalar_prefetch = 0 : i64, scratch_operands = 1 : i64, tpu.core_type = #tpu.core_type<tc>, window_params = [{transform_indices = @transform_0, window_bounds = array<i64: 1, 36, 9, 8>}, {pipeline_mode = #tpu.pipeline_mode<synchronous>, transform_indices = @transform_1, window_bounds = array<i64: 9, 8, 128>}, {pipeline_mode = #tpu.pipeline_mode<synchronous>, transform_indices = @transform_2, window_bounds = array<i64: 9, 128, 128>}, {pipeline_mode = #tpu.pipeline_mode<synchronous>, transform_indices = @transform_3, window_bounds = array<i64: 8, 128>}, {pipeline_mode = #tpu.pipeline_mode<synchronous>, transform_indices = @transform_4, window_bounds = array<i64: 6, 128>}, {transform_indices = @transform_5, window_bounds = array<i64: 1, 8, 8, 128>}]} {
    %c0 = arith.constant 0 : index
    %c0_0 = arith.constant 0 : index
    %c0_1 = arith.constant 0 : index
    %c0_2 = arith.constant 0 : index
    %0 = vector.load %arg1[%c0, %c0_0, %c0_1, %c0_2] : memref<1x36x9x8xbf16, #tpu.memory_space<vmem>>, vector<1x8x8x8xbf16>
    %1 = vector.shape_cast %0 : vector<1x8x8x8xbf16> to vector<8x8x8xbf16>
    %2 = vector.shape_cast %1 : vector<8x8x8xbf16> to vector<64x8xbf16>
    %c0_3 = arith.constant 0 : index
    %c0_4 = arith.constant 0 : index
    %c0_5 = arith.constant 0 : index
    %3 = vector.load %arg2[%c0_3, %c0_4, %c0_5] : memref<9x8x128xbf16, #tpu.memory_space<vmem>>, vector<1x8x128xbf16>
    %4 = vector.shape_cast %3 : vector<1x8x128xbf16> to vector<8x128xbf16>
    %cst = arith.constant dense<0.000000e+00> : vector<64x128xf32>
    %5 = tpu.matmul %2, %4, %cst {dimension_numbers = #tpu.dot_dimension_numbers<[1], [0], [0], [1], [0, 0, 1, 1], [], []>} : vector<64x8xbf16>, vector<8x128xbf16>, vector<64x128xf32> -> vector<64x128xf32>
    %c0_6 = arith.constant 0 : index
    %c9 = arith.constant 9 : index
    %c0_7 = arith.constant 0 : index
    %c0_8 = arith.constant 0 : index
    %6 = vector.load %arg1[%c0_6, %c9, %c0_7, %c0_8] : memref<1x36x9x8xbf16, #tpu.memory_space<vmem>>, vector<1x8x8x8xbf16>
    %7 = vector.shape_cast %6 : vector<1x8x8x8xbf16> to vector<8x8x8xbf16>
    %8 = vector.shape_cast %7 : vector<8x8x8xbf16> to vector<64x8xbf16>
    %c1 = arith.constant 1 : index
    %c0_9 = arith.constant 0 : index
    %c0_10 = arith.constant 0 : index
    %9 = vector.load %arg2[%c1, %c0_9, %c0_10] : memref<9x8x128xbf16, #tpu.memory_space<vmem>>, vector<1x8x128xbf16>
    %10 = vector.shape_cast %9 : vector<1x8x128xbf16> to vector<8x128xbf16>
    %cst_11 = arith.constant dense<0.000000e+00> : vector<64x128xf32>
    %11 = tpu.matmul %8, %10, %cst_11 {dimension_numbers = #tpu.dot_dimension_numbers<[1], [0], [0], [1], [0, 0, 1, 1], [], []>} : vector<64x8xbf16>, vector<8x128xbf16>, vector<64x128xf32> -> vector<64x128xf32>
    %12 = arith.addf %5, %11 : vector<64x128xf32>
    %c0_12 = arith.constant 0 : index
    %c0_13 = arith.constant 0 : index
    %c1_14 = arith.constant 1 : index
    %c0_15 = arith.constant 0 : index
    %13 = vector.load %arg1[%c0_12, %c0_13, %c1_14, %c0_15] : memref<1x36x9x8xbf16, #tpu.memory_space<vmem>>, vector<1x8x8x8xbf16>
    %14 = vector.shape_cast %13 : vector<1x8x8x8xbf16> to vector<8x8x8xbf16>
    %15 = vector.shape_cast %14 : vector<8x8x8xbf16> to vector<64x8xbf16>
    %c2 = arith.constant 2 : index
    %c0_16 = arith.constant 0 : index
    %c0_17 = arith.constant 0 : index
    %16 = vector.load %arg2[%c2, %c0_16, %c0_17] : memref<9x8x128xbf16, #tpu.memory_space<vmem>>, vector<1x8x128xbf16>
    %17 = vector.shape_cast %16 : vector<1x8x128xbf16> to vector<8x128xbf16>
    %cst_18 = arith.constant dense<0.000000e+00> : vector<64x128xf32>
    %18 = tpu.matmul %15, %17, %cst_18 {dimension_numbers = #tpu.dot_dimension_numbers<[1], [0], [0], [1], [0, 0, 1, 1], [], []>} : vector<64x8xbf16>, vector<8x128xbf16>, vector<64x128xf32> -> vector<64x128xf32>
    %19 = arith.addf %12, %18 : vector<64x128xf32>
    %c0_19 = arith.constant 0 : index
    %c18 = arith.constant 18 : index
    %c0_20 = arith.constant 0 : index
    %c0_21 = arith.constant 0 : index
    %20 = vector.load %arg1[%c0_19, %c18, %c0_20, %c0_21] : memref<1x36x9x8xbf16, #tpu.memory_space<vmem>>, vector<1x8x8x8xbf16>
    %21 = vector.shape_cast %20 : vector<1x8x8x8xbf16> to vector<8x8x8xbf16>
    %22 = vector.shape_cast %21 : vector<8x8x8xbf16> to vector<64x8xbf16>
    %c3 = arith.constant 3 : index
    %c0_22 = arith.constant 0 : index
    %c0_23 = arith.constant 0 : index
    %23 = vector.load %arg2[%c3, %c0_22, %c0_23] : memref<9x8x128xbf16, #tpu.memory_space<vmem>>, vector<1x8x128xbf16>
    %24 = vector.shape_cast %23 : vector<1x8x128xbf16> to vector<8x128xbf16>
    %cst_24 = arith.constant dense<0.000000e+00> : vector<64x128xf32>
    %25 = tpu.matmul %22, %24, %cst_24 {dimension_numbers = #tpu.dot_dimension_numbers<[1], [0], [0], [1], [0, 0, 1, 1], [], []>} : vector<64x8xbf16>, vector<8x128xbf16>, vector<64x128xf32> -> vector<64x128xf32>
    %26 = arith.addf %19, %25 : vector<64x128xf32>
    %c0_25 = arith.constant 0 : index
    %c27 = arith.constant 27 : index
    %c0_26 = arith.constant 0 : index
    %c0_27 = arith.constant 0 : index
    %27 = vector.load %arg1[%c0_25, %c27, %c0_26, %c0_27] : memref<1x36x9x8xbf16, #tpu.memory_space<vmem>>, vector<1x8x8x8xbf16>
    %28 = vector.shape_cast %27 : vector<1x8x8x8xbf16> to vector<8x8x8xbf16>
    %29 = vector.shape_cast %28 : vector<8x8x8xbf16> to vector<64x8xbf16>
    %c4 = arith.constant 4 : index
    %c0_28 = arith.constant 0 : index
    %c0_29 = arith.constant 0 : index
    %30 = vector.load %arg2[%c4, %c0_28, %c0_29] : memref<9x8x128xbf16, #tpu.memory_space<vmem>>, vector<1x8x128xbf16>
    %31 = vector.shape_cast %30 : vector<1x8x128xbf16> to vector<8x128xbf16>
    %cst_30 = arith.constant dense<0.000000e+00> : vector<64x128xf32>
    %32 = tpu.matmul %29, %31, %cst_30 {dimension_numbers = #tpu.dot_dimension_numbers<[1], [0], [0], [1], [0, 0, 1, 1], [], []>} : vector<64x8xbf16>, vector<8x128xbf16>, vector<64x128xf32> -> vector<64x128xf32>
    %33 = arith.addf %26, %32 : vector<64x128xf32>
    %c0_31 = arith.constant 0 : index
    %c18_32 = arith.constant 18 : index
    %c1_33 = arith.constant 1 : index
    %c0_34 = arith.constant 0 : index
    %34 = vector.load %arg1[%c0_31, %c18_32, %c1_33, %c0_34] : memref<1x36x9x8xbf16, #tpu.memory_space<vmem>>, vector<1x8x8x8xbf16>
    %35 = vector.shape_cast %34 : vector<1x8x8x8xbf16> to vector<8x8x8xbf16>
    %36 = vector.shape_cast %35 : vector<8x8x8xbf16> to vector<64x8xbf16>
    %c5 = arith.constant 5 : index
    %c0_35 = arith.constant 0 : index
    %c0_36 = arith.constant 0 : index
    %37 = vector.load %arg2[%c5, %c0_35, %c0_36] : memref<9x8x128xbf16, #tpu.memory_space<vmem>>, vector<1x8x128xbf16>
    %38 = vector.shape_cast %37 : vector<1x8x128xbf16> to vector<8x128xbf16>
    %cst_37 = arith.constant dense<0.000000e+00> : vector<64x128xf32>
    %39 = tpu.matmul %36, %38, %cst_37 {dimension_numbers = #tpu.dot_dimension_numbers<[1], [0], [0], [1], [0, 0, 1, 1], [], []>} : vector<64x8xbf16>, vector<8x128xbf16>, vector<64x128xf32> -> vector<64x128xf32>
    %40 = arith.addf %33, %39 : vector<64x128xf32>
    %c0_38 = arith.constant 0 : index
    %c1_39 = arith.constant 1 : index
    %c0_40 = arith.constant 0 : index
    %c0_41 = arith.constant 0 : index
    %41 = vector.load %arg1[%c0_38, %c1_39, %c0_40, %c0_41] : memref<1x36x9x8xbf16, #tpu.memory_space<vmem>>, vector<1x8x8x8xbf16>
    %42 = vector.shape_cast %41 : vector<1x8x8x8xbf16> to vector<8x8x8xbf16>
    %43 = vector.shape_cast %42 : vector<8x8x8xbf16> to vector<64x8xbf16>
    %c6 = arith.constant 6 : index
    %c0_42 = arith.constant 0 : index
    %c0_43 = arith.constant 0 : index
    %44 = vector.load %arg2[%c6, %c0_42, %c0_43] : memref<9x8x128xbf16, #tpu.memory_space<vmem>>, vector<1x8x128xbf16>
    %45 = vector.shape_cast %44 : vector<1x8x128xbf16> to vector<8x128xbf16>
    %cst_44 = arith.constant dense<0.000000e+00> : vector<64x128xf32>
    %46 = tpu.matmul %43, %45, %cst_44 {dimension_numbers = #tpu.dot_dimension_numbers<[1], [0], [0], [1], [0, 0, 1, 1], [], []>} : vector<64x8xbf16>, vector<8x128xbf16>, vector<64x128xf32> -> vector<64x128xf32>
    %47 = arith.addf %40, %46 : vector<64x128xf32>
    %c0_45 = arith.constant 0 : index
    %c10 = arith.constant 10 : index
    %c0_46 = arith.constant 0 : index
    %c0_47 = arith.constant 0 : index
    %48 = vector.load %arg1[%c0_45, %c10, %c0_46, %c0_47] : memref<1x36x9x8xbf16, #tpu.memory_space<vmem>>, vector<1x8x8x8xbf16>
    %49 = vector.shape_cast %48 : vector<1x8x8x8xbf16> to vector<8x8x8xbf16>
    %50 = vector.shape_cast %49 : vector<8x8x8xbf16> to vector<64x8xbf16>
    %c7 = arith.constant 7 : index
    %c0_48 = arith.constant 0 : index
    %c0_49 = arith.constant 0 : index
    %51 = vector.load %arg2[%c7, %c0_48, %c0_49] : memref<9x8x128xbf16, #tpu.memory_space<vmem>>, vector<1x8x128xbf16>
    %52 = vector.shape_cast %51 : vector<1x8x128xbf16> to vector<8x128xbf16>
    %cst_50 = arith.constant dense<0.000000e+00> : vector<64x128xf32>
    %53 = tpu.matmul %50, %52, %cst_50 {dimension_numbers = #tpu.dot_dimension_numbers<[1], [0], [0], [1], [0, 0, 1, 1], [], []>} : vector<64x8xbf16>, vector<8x128xbf16>, vector<64x128xf32> -> vector<64x128xf32>
    %54 = arith.addf %47, %53 : vector<64x128xf32>
    %c0_51 = arith.constant 0 : index
    %c1_52 = arith.constant 1 : index
    %c1_53 = arith.constant 1 : index
    %c0_54 = arith.constant 0 : index
    %55 = vector.load %arg1[%c0_51, %c1_52, %c1_53, %c0_54] : memref<1x36x9x8xbf16, #tpu.memory_space<vmem>>, vector<1x8x8x8xbf16>
    %56 = vector.shape_cast %55 : vector<1x8x8x8xbf16> to vector<8x8x8xbf16>
    %57 = vector.shape_cast %56 : vector<8x8x8xbf16> to vector<64x8xbf16>
    %c8 = arith.constant 8 : index
    %c0_55 = arith.constant 0 : index
    %c0_56 = arith.constant 0 : index
    %58 = vector.load %arg2[%c8, %c0_55, %c0_56] : memref<9x8x128xbf16, #tpu.memory_space<vmem>>, vector<1x8x128xbf16>
    %59 = vector.shape_cast %58 : vector<1x8x128xbf16> to vector<8x128xbf16>
    %cst_57 = arith.constant dense<0.000000e+00> : vector<64x128xf32>
    %60 = tpu.matmul %57, %59, %cst_57 {dimension_numbers = #tpu.dot_dimension_numbers<[1], [0], [0], [1], [0, 0, 1, 1], [], []>} : vector<64x8xbf16>, vector<8x128xbf16>, vector<64x128xf32> -> vector<64x128xf32>
    %61 = arith.addf %54, %60 : vector<64x128xf32>
    %c0_58 = arith.constant 0 : index
    %c0_59 = arith.constant 0 : index
    %62 = vector.load %arg5[%c0_58, %c0_59] : memref<6x128xf32, #tpu.memory_space<vmem>>, vector<1x128xf32>
    %63 = vector.broadcast %62 : vector<1x128xf32> to vector<64x128xf32>
    %64 = arith.mulf %61, %63 : vector<64x128xf32>
    %c1_60 = arith.constant 1 : index
    %c0_61 = arith.constant 0 : index
    %65 = vector.load %arg5[%c1_60, %c0_61] : memref<6x128xf32, #tpu.memory_space<vmem>>, vector<1x128xf32>
    %66 = vector.broadcast %65 : vector<1x128xf32> to vector<64x128xf32>
    %67 = arith.addf %64, %66 : vector<64x128xf32>
    %cst_62 = arith.constant 0.000000e+00 : f32
    %68 = vector.broadcast %cst_62 : f32 to vector<64x128xf32>
    %69 = arith.cmpf ogt, %67, %68 : vector<64x128xf32>
    %cst_63 = arith.constant 0.00999999977 : f32
    %70 = vector.broadcast %cst_63 : f32 to vector<64x128xf32>
    %71 = arith.mulf %70, %67 : vector<64x128xf32>
    %72 = arith.select %69, %67, %71 : vector<64x128xi1>, vector<64x128xf32>
    %cst_64 = arith.constant 0.000000e+00 : bf16
    %73 = vector.broadcast %cst_64 : bf16 to vector<10x10x128xbf16>
    %c0_65 = arith.constant 0 : index
    %c0_66 = arith.constant 0 : index
    %c0_67 = arith.constant 0 : index
    %74 = vector.load %arg7[%c0_65, %c0_66, %c0_67] : memref<10x10x128xbf16, #tpu.memory_space<vmem>>, vector<10x10x128xbf16>
    tpu.vector_store %arg7[%c0_65, %c0_66, %c0_67], %73 {strides = array<i32>} : memref<10x10x128xbf16, #tpu.memory_space<vmem>>, vector<10x10x128xbf16>,
    %75 = vector.shape_cast %72 : vector<64x128xf32> to vector<8x8x128xf32>
    %76 = arith.truncf %75 : vector<8x8x128xf32> to vector<8x8x128xbf16>
    %c1_68 = arith.constant 1 : index
    %c1_69 = arith.constant 1 : index
    %c0_70 = arith.constant 0 : index
    %77 = vector.load %arg7[%c1_68, %c1_69, %c0_70] : memref<10x10x128xbf16, #tpu.memory_space<vmem>>, vector<8x8x128xbf16>
    tpu.vector_store %arg7[%c1_68, %c1_69, %c0_70], %76 {strides = array<i32>} : memref<10x10x128xbf16, #tpu.memory_space<vmem>>, vector<8x8x128xbf16>,
    %c0_71 = arith.constant 0 : index
    %c0_72 = arith.constant 0 : index
    %c0_73 = arith.constant 0 : index
    %78 = vector.load %arg7[%c0_71, %c0_72, %c0_73] : memref<10x10x128xbf16, #tpu.memory_space<vmem>>, vector<8x8x128xbf16>
    %79 = vector.shape_cast %78 : vector<8x8x128xbf16> to vector<64x128xbf16>
    %c0_74 = arith.constant 0 : index
    %c0_75 = arith.constant 0 : index
    %c0_76 = arith.constant 0 : index
    %80 = vector.load %arg3[%c0_74, %c0_75, %c0_76] : memref<9x128x128xbf16, #tpu.memory_space<vmem>>, vector<1x128x128xbf16>
    %81 = vector.shape_cast %80 : vector<1x128x128xbf16> to vector<128x128xbf16>
    %cst_77 = arith.constant dense<0.000000e+00> : vector<64x128xf32>
    %82 = tpu.matmul %79, %81, %cst_77 {dimension_numbers = #tpu.dot_dimension_numbers<[1], [0], [0], [1], [0, 0, 1, 1], [], []>} : vector<64x128xbf16>, vector<128x128xbf16>, vector<64x128xf32> -> vector<64x128xf32>
    %c0_78 = arith.constant 0 : index
    %c1_79 = arith.constant 1 : index
    %c0_80 = arith.constant 0 : index
    %83 = vector.load %arg7[%c0_78, %c1_79, %c0_80] : memref<10x10x128xbf16, #tpu.memory_space<vmem>>, vector<8x8x128xbf16>
    %84 = vector.shape_cast %83 : vector<8x8x128xbf16> to vector<64x128xbf16>
    %c1_81 = arith.constant 1 : index
    %c0_82 = arith.constant 0 : index
    %c0_83 = arith.constant 0 : index
    %85 = vector.load %arg3[%c1_81, %c0_82, %c0_83] : memref<9x128x128xbf16, #tpu.memory_space<vmem>>, vector<1x128x128xbf16>
    %86 = vector.shape_cast %85 : vector<1x128x128xbf16> to vector<128x128xbf16>
    %cst_84 = arith.constant dense<0.000000e+00> : vector<64x128xf32>
    %87 = tpu.matmul %84, %86, %cst_84 {dimension_numbers = #tpu.dot_dimension_numbers<[1], [0], [0], [1], [0, 0, 1, 1], [], []>} : vector<64x128xbf16>, vector<128x128xbf16>, vector<64x128xf32> -> vector<64x128xf32>
    %88 = arith.addf %82, %87 : vector<64x128xf32>
    %c0_85 = arith.constant 0 : index
    %c2_86 = arith.constant 2 : index
    %c0_87 = arith.constant 0 : index
    %89 = vector.load %arg7[%c0_85, %c2_86, %c0_87] : memref<10x10x128xbf16, #tpu.memory_space<vmem>>, vector<8x8x128xbf16>
    %90 = vector.shape_cast %89 : vector<8x8x128xbf16> to vector<64x128xbf16>
    %c2_88 = arith.constant 2 : index
    %c0_89 = arith.constant 0 : index
    %c0_90 = arith.constant 0 : index
    %91 = vector.load %arg3[%c2_88, %c0_89, %c0_90] : memref<9x128x128xbf16, #tpu.memory_space<vmem>>, vector<1x128x128xbf16>
    %92 = vector.shape_cast %91 : vector<1x128x128xbf16> to vector<128x128xbf16>
    %cst_91 = arith.constant dense<0.000000e+00> : vector<64x128xf32>
    %93 = tpu.matmul %90, %92, %cst_91 {dimension_numbers = #tpu.dot_dimension_numbers<[1], [0], [0], [1], [0, 0, 1, 1], [], []>} : vector<64x128xbf16>, vector<128x128xbf16>, vector<64x128xf32> -> vector<64x128xf32>
    %94 = arith.addf %88, %93 : vector<64x128xf32>
    %c1_92 = arith.constant 1 : index
    %c0_93 = arith.constant 0 : index
    %c0_94 = arith.constant 0 : index
    %95 = vector.load %arg7[%c1_92, %c0_93, %c0_94] : memref<10x10x128xbf16, #tpu.memory_space<vmem>>, vector<8x8x128xbf16>
    %96 = vector.shape_cast %95 : vector<8x8x128xbf16> to vector<64x128xbf16>
    %c3_95 = arith.constant 3 : index
    %c0_96 = arith.constant 0 : index
    %c0_97 = arith.constant 0 : index
    %97 = vector.load %arg3[%c3_95, %c0_96, %c0_97] : memref<9x128x128xbf16, #tpu.memory_space<vmem>>, vector<1x128x128xbf16>
    %98 = vector.shape_cast %97 : vector<1x128x128xbf16> to vector<128x128xbf16>
    %cst_98 = arith.constant dense<0.000000e+00> : vector<64x128xf32>
    %99 = tpu.matmul %96, %98, %cst_98 {dimension_numbers = #tpu.dot_dimension_numbers<[1], [0], [0], [1], [0, 0, 1, 1], [], []>} : vector<64x128xbf16>, vector<128x128xbf16>, vector<64x128xf32> -> vector<64x128xf32>
    %100 = arith.addf %94, %99 : vector<64x128xf32>
    %c1_99 = arith.constant 1 : index
    %c1_100 = arith.constant 1 : index
    %c0_101 = arith.constant 0 : index
    %101 = vector.load %arg7[%c1_99, %c1_100, %c0_101] : memref<10x10x128xbf16, #tpu.memory_space<vmem>>, vector<8x8x128xbf16>
    %102 = vector.shape_cast %101 : vector<8x8x128xbf16> to vector<64x128xbf16>
    %c4_102 = arith.constant 4 : index
    %c0_103 = arith.constant 0 : index
    %c0_104 = arith.constant 0 : index
    %103 = vector.load %arg3[%c4_102, %c0_103, %c0_104] : memref<9x128x128xbf16, #tpu.memory_space<vmem>>, vector<1x128x128xbf16>
    %104 = vector.shape_cast %103 : vector<1x128x128xbf16> to vector<128x128xbf16>
    %cst_105 = arith.constant dense<0.000000e+00> : vector<64x128xf32>
    %105 = tpu.matmul %102, %104, %cst_105 {dimension_numbers = #tpu.dot_dimension_numbers<[1], [0], [0], [1], [0, 0, 1, 1], [], []>} : vector<64x128xbf16>, vector<128x128xbf16>, vector<64x128xf32> -> vector<64x128xf32>
    %106 = arith.addf %100, %105 : vector<64x128xf32>
    %c1_106 = arith.constant 1 : index
    %c2_107 = arith.constant 2 : index
    %c0_108 = arith.constant 0 : index
    %107 = vector.load %arg7[%c1_106, %c2_107, %c0_108] : memref<10x10x128xbf16, #tpu.memory_space<vmem>>, vector<8x8x128xbf16>
    %108 = vector.shape_cast %107 : vector<8x8x128xbf16> to vector<64x128xbf16>
    %c5_109 = arith.constant 5 : index
    %c0_110 = arith.constant 0 : index
    %c0_111 = arith.constant 0 : index
    %109 = vector.load %arg3[%c5_109, %c0_110, %c0_111] : memref<9x128x128xbf16, #tpu.memory_space<vmem>>, vector<1x128x128xbf16>
    %110 = vector.shape_cast %109 : vector<1x128x128xbf16> to vector<128x128xbf16>
    %cst_112 = arith.constant dense<0.000000e+00> : vector<64x128xf32>
    %111 = tpu.matmul %108, %110, %cst_112 {dimension_numbers = #tpu.dot_dimension_numbers<[1], [0], [0], [1], [0, 0, 1, 1], [], []>} : vector<64x128xbf16>, vector<128x128xbf16>, vector<64x128xf32> -> vector<64x128xf32>
    %112 = arith.addf %106, %111 : vector<64x128xf32>
    %c2_113 = arith.constant 2 : index
    %c0_114 = arith.constant 0 : index
    %c0_115 = arith.constant 0 : index
    %113 = vector.load %arg7[%c2_113, %c0_114, %c0_115] : memref<10x10x128xbf16, #tpu.memory_space<vmem>>, vector<8x8x128xbf16>
    %114 = vector.shape_cast %113 : vector<8x8x128xbf16> to vector<64x128xbf16>
    %c6_116 = arith.constant 6 : index
    %c0_117 = arith.constant 0 : index
    %c0_118 = arith.constant 0 : index
    %115 = vector.load %arg3[%c6_116, %c0_117, %c0_118] : memref<9x128x128xbf16, #tpu.memory_space<vmem>>, vector<1x128x128xbf16>
    %116 = vector.shape_cast %115 : vector<1x128x128xbf16> to vector<128x128xbf16>
    %cst_119 = arith.constant dense<0.000000e+00> : vector<64x128xf32>
    %117 = tpu.matmul %114, %116, %cst_119 {dimension_numbers = #tpu.dot_dimension_numbers<[1], [0], [0], [1], [0, 0, 1, 1], [], []>} : vector<64x128xbf16>, vector<128x128xbf16>, vector<64x128xf32> -> vector<64x128xf32>
    %118 = arith.addf %112, %117 : vector<64x128xf32>
    %c2_120 = arith.constant 2 : index
    %c1_121 = arith.constant 1 : index
    %c0_122 = arith.constant 0 : index
    %119 = vector.load %arg7[%c2_120, %c1_121, %c0_122] : memref<10x10x128xbf16, #tpu.memory_space<vmem>>, vector<8x8x128xbf16>
    %120 = vector.shape_cast %119 : vector<8x8x128xbf16> to vector<64x128xbf16>
    %c7_123 = arith.constant 7 : index
    %c0_124 = arith.constant 0 : index
    %c0_125 = arith.constant 0 : index
    %121 = vector.load %arg3[%c7_123, %c0_124, %c0_125] : memref<9x128x128xbf16, #tpu.memory_space<vmem>>, vector<1x128x128xbf16>
    %122 = vector.shape_cast %121 : vector<1x128x128xbf16> to vector<128x128xbf16>
    %cst_126 = arith.constant dense<0.000000e+00> : vector<64x128xf32>
    %123 = tpu.matmul %120, %122, %cst_126 {dimension_numbers = #tpu.dot_dimension_numbers<[1], [0], [0], [1], [0, 0, 1, 1], [], []>} : vector<64x128xbf16>, vector<128x128xbf16>, vector<64x128xf32> -> vector<64x128xf32>
    %124 = arith.addf %118, %123 : vector<64x128xf32>
    %c2_127 = arith.constant 2 : index
    %c2_128 = arith.constant 2 : index
    %c0_129 = arith.constant 0 : index
    %125 = vector.load %arg7[%c2_127, %c2_128, %c0_129] : memref<10x10x128xbf16, #tpu.memory_space<vmem>>, vector<8x8x128xbf16>
    %126 = vector.shape_cast %125 : vector<8x8x128xbf16> to vector<64x128xbf16>
    %c8_130 = arith.constant 8 : index
    %c0_131 = arith.constant 0 : index
    %c0_132 = arith.constant 0 : index
    %127 = vector.load %arg3[%c8_130, %c0_131, %c0_132] : memref<9x128x128xbf16, #tpu.memory_space<vmem>>, vector<1x128x128xbf16>
    %128 = vector.shape_cast %127 : vector<1x128x128xbf16> to vector<128x128xbf16>
    %cst_133 = arith.constant dense<0.000000e+00> : vector<64x128xf32>
    %129 = tpu.matmul %126, %128, %cst_133 {dimension_numbers = #tpu.dot_dimension_numbers<[1], [0], [0], [1], [0, 0, 1, 1], [], []>} : vector<64x128xbf16>, vector<128x128xbf16>, vector<64x128xf32> -> vector<64x128xf32>
    %130 = arith.addf %124, %129 : vector<64x128xf32>
    %c2_134 = arith.constant 2 : index
    %c0_135 = arith.constant 0 : index
    %131 = vector.load %arg5[%c2_134, %c0_135] : memref<6x128xf32, #tpu.memory_space<vmem>>, vector<1x128xf32>
    %132 = vector.broadcast %131 : vector<1x128xf32> to vector<64x128xf32>
    %133 = arith.mulf %130, %132 : vector<64x128xf32>
    %c3_136 = arith.constant 3 : index
    %c0_137 = arith.constant 0 : index
    %134 = vector.load %arg5[%c3_136, %c0_137] : memref<6x128xf32, #tpu.memory_space<vmem>>, vector<1x128xf32>
    %135 = vector.broadcast %134 : vector<1x128xf32> to vector<64x128xf32>
    %136 = arith.addf %133, %135 : vector<64x128xf32>
    %c0_138 = arith.constant 0 : index
    %c27_139 = arith.constant 27 : index
    %c0_140 = arith.constant 0 : index
    %c0_141 = arith.constant 0 : index
    %137 = vector.load %arg1[%c0_138, %c27_139, %c0_140, %c0_141] : memref<1x36x9x8xbf16, #tpu.memory_space<vmem>>, vector<1x8x8x8xbf16>
    %138 = vector.shape_cast %137 : vector<1x8x8x8xbf16> to vector<8x8x8xbf16>
    %139 = vector.shape_cast %138 : vector<8x8x8xbf16> to vector<64x8xbf16>
    %c0_142 = arith.constant 0 : index
    %c0_143 = arith.constant 0 : index
    %140 = vector.load %arg4[%c0_142, %c0_143] : memref<8x128xbf16, #tpu.memory_space<vmem>>, vector<8x128xbf16>
    %cst_144 = arith.constant dense<0.000000e+00> : vector<64x128xf32>
    %141 = tpu.matmul %139, %140, %cst_144 {dimension_numbers = #tpu.dot_dimension_numbers<[1], [0], [0], [1], [0, 0, 1, 1], [], []>} : vector<64x8xbf16>, vector<8x128xbf16>, vector<64x128xf32> -> vector<64x128xf32>
    %c4_145 = arith.constant 4 : index
    %c0_146 = arith.constant 0 : index
    %142 = vector.load %arg5[%c4_145, %c0_146] : memref<6x128xf32, #tpu.memory_space<vmem>>, vector<1x128xf32>
    %143 = vector.broadcast %142 : vector<1x128xf32> to vector<64x128xf32>
    %144 = arith.mulf %141, %143 : vector<64x128xf32>
    %c5_147 = arith.constant 5 : index
    %c0_148 = arith.constant 0 : index
    %145 = vector.load %arg5[%c5_147, %c0_148] : memref<6x128xf32, #tpu.memory_space<vmem>>, vector<1x128xf32>
    %146 = vector.broadcast %145 : vector<1x128xf32> to vector<64x128xf32>
    %147 = arith.addf %144, %146 : vector<64x128xf32>
    %148 = arith.addf %136, %147 : vector<64x128xf32>
    %cst_149 = arith.constant 0.000000e+00 : f32
    %149 = vector.broadcast %cst_149 : f32 to vector<64x128xf32>
    %150 = arith.maximumf %148, %149 : vector<64x128xf32>
    %151 = vector.shape_cast %150 : vector<64x128xf32> to vector<8x8x128xf32>
    %c0_150 = arith.constant 0 : index
    %c0_151 = arith.constant 0 : index
    %c0_152 = arith.constant 0 : index
    %c0_153 = arith.constant 0 : index
    %152 = vector.load %arg6[%c0_150, %c0_151, %c0_152, %c0_153] : memref<1x8x8x128xf32, #tpu.memory_space<vmem>>, vector<1x8x8x128xf32>
    %153 = vector.shape_cast %152 : vector<1x8x8x128xf32> to vector<8x8x128xf32>
    %154 = vector.shape_cast %151 : vector<8x8x128xf32> to vector<1x8x8x128xf32>
    tpu.vector_store %arg6[%c0_150, %c0_151, %c0_152, %c0_153], %154 {strides = array<i32>} : memref<1x8x8x128xf32, #tpu.memory_space<vmem>>, vector<1x8x8x128xf32>,
    return
  }
  func.func @transform_0(%arg0: i32) -> (i32, i32, i32, i32) {
    %c0_i32 = arith.constant 0 : i32
    %c0_i32_0 = arith.constant 0 : i32
    %c0_i32_1 = arith.constant 0 : i32
    %c0_i32_2 = arith.constant 0 : i32
    return %arg0, %c0_i32, %c0_i32_0, %c0_i32_1 : i32, i32, i32, i32
  }
  func.func @transform_1(%arg0: i32) -> (i32, i32, i32) {
    %c0_i32 = arith.constant 0 : i32
    %c0_i32_0 = arith.constant 0 : i32
    %c0_i32_1 = arith.constant 0 : i32
    %c0_i32_2 = arith.constant 0 : i32
    return %c0_i32, %c0_i32_0, %c0_i32_1 : i32, i32, i32
  }
  func.func @transform_2(%arg0: i32) -> (i32, i32, i32) {
    %c0_i32 = arith.constant 0 : i32
    %c0_i32_0 = arith.constant 0 : i32
    %c0_i32_1 = arith.constant 0 : i32
    %c0_i32_2 = arith.constant 0 : i32
    return %c0_i32, %c0_i32_0, %c0_i32_1 : i32, i32, i32
  }
  func.func @transform_3(%arg0: i32) -> (i32, i32) {
    %c0_i32 = arith.constant 0 : i32
    %c0_i32_0 = arith.constant 0 : i32
    %c0_i32_1 = arith.constant 0 : i32
    return %c0_i32, %c0_i32_0 : i32, i32
  }
  func.func @transform_4(%arg0: i32) -> (i32, i32) {
    %c0_i32 = arith.constant 0 : i32
    %c0_i32_0 = arith.constant 0 : i32
    %c0_i32_1 = arith.constant 0 : i32
    return %c0_i32, %c0_i32_0 : i32, i32
  }
  func.func @transform_5(%arg0: i32) -> (i32, i32, i32, i32) {
    %c0_i32 = arith.constant 0 : i32
    %c0_i32_0 = arith.constant 0 : i32
    %c0_i32_1 = arith.constant 0 : i32
    %c0_i32_2 = arith.constant 0 : i32
    return %arg0, %c0_i32, %c0_i32_0, %c0_i32_1 : i32, i32, i32, i32
  }
}

</mosaic_0001>

<bundles_post_ra>
// kernel: basic_block_forward.1
= control target key start
LH: loop header
LB: loop body
LE: loop exit
PB: predicated region body
PF: predicated region fallthrough
CT: control target
= control target key end

     0   :  { %s5293_s18 = smov 0   ;;  %s6227_s0 = inlined_call_operand.vmem [shape: bf16[2,36,9,8], index: 0, kind: input, shape index: {}]   ;;  %s6228_s1 = inlined_call_operand.vmem [shape: bf16[9,8,128], index: 1, kind: input, shape index: {}]   ;;  %s6229_s2 = inlined_call_operand.vmem [shape: bf16[9,128,128], index: 2, kind: input, shape index: {}]   ;;  %s6230_s3 = inlined_call_operand.vmem [shape: bf16[8,128], index: 3, kind: input, shape index: {}]   ;;  %s6231_s4 = inlined_call_operand.vmem [shape: f32[6,128], index: 4, kind: input, shape index: {}]   ;;  %s6232_s5 = inlined_call_operand.vmem [shape: f32[2,8,8,128], index: 5, kind: output, shape index: {}]  }
   0x1 LB: > { %s4059_s19 = sadd.s32 4294967295, %s5260_s18   ;;  %p4063_p0 = scmp.ge.s32.totalorder %s5260_s18, 1  ;;  %s5260_s18 = sphi %s5293_s18, %s15_s18  }
   0x2   : > { %p187_p1 = scmp.lt.s32.totalorder %s5260_s18, 3 }
   0x4   : > { %p188_p2 = pnand %p4063_p0, %p187_p1 }
   0x5   : > { %v4075_v0 = vld [vmem:[%s6228_s1 + $0x4] sm:$0xf] (!%p188_p2)  ;;  %vm279_vm0 = vcmask (!%p188_p2), 1043456   ;;  %p215_p3 = scmp.lt.s32.totalorder (!%p188_p2), %s4059_s19, 1  ;;  %v234_v2 = vld [vmem:[%s6228_s1] sm:$0xf] (!%p188_p2) }
   0x6   : > { %191 = sbr.rel (%p188_p2) target bundleno = 823 (0x337), region = 40  ;;  %5122 = vmatprep.subr.msk.bf16.mxu0 (!%p188_p2), %vm279_vm0, %v4075_v0  ;;  %v281_v1 = vsel (!%p188_p2), %vm279_vm0, %v4075_v0, 0  ;;  %vm266_vm1 = vcmask (!%p188_p2), 64512   ;;  %v381_v3 = vsel (!%p188_p2), %vm279_vm0, %v234_v2, 0  ;;  %v4092_v5 = vld [vmem:[%s6228_s1 + $0x8] sm:$0xf] (!%p188_p2) }
   0x7   : > { %4679 = vmatpush3.bf16.msra.mxu0 (!%p188_p2), %v281_v1  ;;  %vm464_vm2 = vsmask.f32 (!%p188_p2), 3328  ;;  %vm465_vm3 = vsmask.f32 (!%p188_p2), 7440  ;;  %v606_v50 = vsel (!%p188_p2), %vm279_vm0, %v4092_v5, 0  ;;  %vm1806_vm6 = vcmask (!%p188_p2), 1040384  }
   0x8   : > { %5123 = vmatprep.subr.msk.bf16.mxu0 (!%p188_p2), %vm279_vm0, %v234_v2  ;;  %vm5346_vm4 = vmor (!%p188_p2), %vm464_vm2, %vm465_vm3  ;;  %v4109_v55 = vld [vmem:[%s6228_s1 + $0xc] sm:$0xf] (!%p188_p2)  ;;  %vm1801_vm5 = vsmask.f32 (!%p188_p2), 7938  ;;  %vm1807_vm7 = vsmask.f32 (!%p188_p2), 256 }
   0x9   : > { %vm2305_vm12 = vcmask (!%p188_p2), 1042432   ;;  %vm2306_vm13 = vcmask (!%p188_p2), 1046532   ;;  %vm5712_vm14 = vmand (!%p188_p2), %vm279_vm0, %vm1801_vm5  ;;  %v5246_v40 = vld [vmem:[%s6229_s2 + $0x220] sm:$0xff] (!%p188_p2)  }
   0xa   : > { %vm5719_vm15 = vmand (!%p188_p2), %vm1806_vm6, %vm1807_vm7 }
   0xb   : > { %vm5743_vm5 = vmor (!%p188_p2), %vm2305_vm12, %vm2306_vm13 }
   0xd   : > { %s6242_s19 = smov (!%p215_p3, %s4059_s19), 1 }
   0xe   : > { %s5132_s24 = smul.u32 288, %s6242_s19  ;;  %s4511_s20 = sshll.u32 %s6242_s19, 6 }
   0xf   : > { %s6208_s23 = scalar_lea.vmem %s6232_s5, %s4511_s20 }
  0x10   : > { %s5316_s27 = scalar_lea.vmem %s6227_s0, %s5132_s24 }
  0x11   : > { %v5142_v4 = vld [vmem:[%s5316_s27 + $0x48] ss:$8 sps:$4 sm:$0xff]   ;;  %v5143_v6 = vld [vmem:[%s5316_s27 + $0x58] ss:$8 sps:$4 sm:$0xff]   ;;  %v449_v11 = vld [vmem:[%s5316_s27 + $0x4] sm:$0x1] }
  0x12   : > { %4680 = vmatprep.mubr.msk.bf16.mxu0 %vm266_vm1, %v5142_v4  ;;  %v5144_v7 = vld [vmem:[%s5316_s27 + $0x68] ss:$8 sps:$4 sm:$0xff]   ;;  %v5145_v8 = vld [vmem:[%s5316_s27 + $0x78] ss:$8 sps:$4 sm:$0xff]   ;;  %v451_v13 = vld [vmem:[%s5316_s27 + $0xc] sm:$0x1] }
  0x13   : > { %4681 = vmatmul.mubr.msk.bf16.vlgmr.msra.gmra.mrb[0].mxu0 %vm266_vm1, %v5143_v6  ;;  %v5146_v9 = vld [vmem:[%s5316_s27] ss:$8 sps:$4 sm:$0xff]   ;;  %v477_v17 = vshll.u32 %v449_v11, 16  ;;  %v452_v19 = vld [vmem:[%s5316_s27 + $0x10] sm:$0xf]  ;;  %v491_v23 = vshll.u32 %v451_v13, 16 }
  0x14   : > { %4689 = vmatpush3.bf16.msra.mxu0 %v381_v3  ;;  %4684 = vmatprep.mubr.msk.bf16.mxu0 %vm266_vm1, %v5144_v7  ;;  %v448_v10 = vld [vmem:[%s5316_s27] sm:$0xf]  ;;  %v450_v12 = vld [vmem:[%s5316_s27 + $0x8] sm:$0xf]  ;;  %v454_v24 = vld [vmem:[%s5316_s27 + $0x18] sm:$0xf] }
  0x15   : > { %5124 = vmatprep.subr.msk.bf16.mxu0 %vm279_vm0, %v4092_v5  ;;  %v468_v14 = vshrl.u32 %v448_v10, 16  ;;  %v471_v15 = vshll.u32 %v448_v10, 16  ;;  %v482_v16 = vshrl.u32 %v450_v12, 16  ;;  %v485_v18 = vshll.u32 %v450_v12, 16  ;;  %v5147_v28 = vld [vmem:[%s5316_s27 + $0x10] ss:$8 sps:$4 sm:$0xff]  }
  0x16   : > { %v496_v26 = vshrl.u32 %v452_v19, 16  ;;  %v499_v27 = vshll.u32 %v452_v19, 16  ;;  %v453_v30 = vld [vmem:[%s5316_s27 + $0x14] sm:$0x1]  ;;  %v510_v31 = vshrl.u32 %v454_v24, 16  ;;  %v513_v32 = vshll.u32 %v454_v24, 16 }
  0x17   : > { %v470_v20 = vrot.slane %v468_v14, 4  ;;  %v473_v21 = vrot.slane %v471_v15, 5  ;;  %v484_v22 = vrot.slane %v482_v16, 4  ;;  %v487_v25 = vrot.slane %v485_v18, 5  ;;  %v456_v33 = vld [vmem:[%s5316_s27 + $0x20] sm:$0xf] }
  0x18   : > { %v5148_v34 = vld [vmem:[%s5316_s27 + $0x20] ss:$8 sps:$4 sm:$0xff]   ;;  %v479_v35 = vrot.slane %v477_v17, 5  ;;  %v455_v37 = vld [vmem:[%s5316_s27 + $0x1c] sm:$0x1]  ;;  %v498_v38 = vrot.slane %v496_v26, 4 }
  0x19   : > { %v474_v29 = vor.u32 %v473_v21, %v470_v20  ;;  %v488_v36 = vor.u32 %v487_v25, %v484_v22  ;;  %v501_v39 = vrot.slane %v499_v27, 5  ;;  %v493_v42 = vrot.slane %v491_v23, 5  ;;  %v458_v45 = vld [vmem:[%s5316_s27 + $0x28] sm:$0xf]  ;;  %v457_v48 = vld [vmem:[%s5316_s27 + $0x24] sm:$0x1] }
  0x1a   : > { %v512_v43 = vrot.slane %v510_v31, 4  ;;  %v515_v44 = vrot.slane %v513_v32, 5  ;;  %v505_v47 = vshll.u32 %v453_v30, 16  ;;  %v524_v49 = vshrl.u32 %v456_v33, 16  ;;  %v459_v52 = vld [vmem:[%s5316_s27 + $0x2c] sm:$0x1] }
  0x1b   : > { %4685 = vmatmul.mubr.msk.bf16.gmra.mrb[4].mxu0 %vm266_vm1, %v5145_v8  ;;  %v475_v41 = vrot.slane %v474_v29, 4  ;;  %v489_v46 = vrot.slane %v488_v36, 4  ;;  %v519_v51 = vshll.u32 %v455_v37, 16  ;;  %v527_v53 = vshll.u32 %v456_v33, 16  ;;  %v460_v59 = vld [vmem:[%s5316_s27 + $0x30] sm:$0xf] }
  0x1c   : > { %4690 = vmatprep.mubr.msk.bf16.mxu0 %vm266_vm1, %v5146_v9  ;;  %v502_v56 = vor.u32 %v501_v39, %v498_v38  ;;  %v526_v57 = vrot.slane %v524_v49, 4  ;;  %v538_v58 = vshrl.u32 %v458_v45, 16  ;;  %v516_v61 = vor.u32 %v515_v44, %v512_v43  ;;  %v462_v0 = vld [vmem:[%s5316_s27 + $0x38] sm:$0xf]  ;;  %v461_v13 = vld [vmem:[%s5316_s27 + $0x34] sm:$0x1] }
  0x1d   : > { %v480_v54 = vsel %vm5346_vm4, %v475_v41, %v479_v35  ;;  %v494_v60 = vsel %vm5346_vm4, %v489_v46, %v493_v42  ;;  %v529_v62 = vrot.slane %v527_v53, 5  ;;  %v533_v63 = vshll.u32 %v457_v48, 16  ;;  %v5149_v5 = vld [vmem:[%s5316_s27 + $0x30] ss:$8 sps:$4 sm:$0xff]   ;;  %v463_v19 = vld [vmem:[%s5316_s27 + $0x3c] sm:$0x1] }
  0x1e   : > { %v507_v1 = vrot.slane %v505_v47, 5  ;;  %v540_v2 = vrot.slane %v538_v58, 4  ;;  %v541_v3 = vshll.u32 %v458_v45, 16  ;;  %v547_v4 = vshll.u32 %v459_v52, 16  ;;  %v4126_v43 = vld [vmem:[%s6228_s1 + $0x10] sm:$0xf] }
  0x1f   : > { %v521_v6 = vrot.slane %v519_v51, 5  ;;  %v530_v7 = vor.u32 %v529_v62, %v526_v57  ;;  %v552_v8 = vshrl.u32 %v460_v59, 16  ;;  %v555_v9 = vshll.u32 %v460_v59, 16  ;;  %v4135_v44 = vld [vmem:[%s5316_s27 + $0x90] sm:$0xf] }
  0x20   : > { %v4093_v10 = vcombine.low %v480_v54, %v494_v60  ;;  %v503_v11 = vrot.slane %v502_v56, 4  ;;  %v543_v12 = vrot.slane %v541_v3, 5  ;;  %v517_v14 = vrot.slane %v516_v61, 4  ;;  %v4137_v45 = vld [vmem:[%s5316_s27 + $0x98] sm:$0xf] }
  0x21   : > { %v535_v15 = vrot.slane %v533_v63, 5  ;;  %v549_v16 = vrot.slane %v547_v4, 5  ;;  %v566_v17 = vshrl.u32 %v462_v0, 16  ;;  %v554_v20 = vrot.slane %v552_v8, 4  ;;  %v4136_v48 = vld [vmem:[%s5316_s27 + $0x94] sm:$0x1] }
  0x22   : > { %v544_v18 = vor.u32 %v543_v12, %v540_v2  ;;  %v557_v21 = vrot.slane %v555_v9, 5  ;;  %v569_v22 = vshll.u32 %v462_v0, 16  ;;  %v531_v23 = vrot.slane %v530_v7, 4  ;;  %v5396_v49 = vld [vmem:[%s6228_s1 + $0x14] sm:$0xf] }
  0x23   : > { %4691 = vmatmul.mubr.msk.bf16.vlgmr.msra.gmra.mrb[0].mxu0 %vm266_vm1, %v5147_v28  ;;  %v568_v24 = vrot.slane %v566_v17, 4  ;;  %v508_v27 = vsel %vm5346_vm4, %v503_v11, %v507_v1  ;;  %v561_v28 = vshll.u32 %v461_v13, 16  ;;  %v522_v29 = vsel %vm5346_vm4, %v517_v14, %v521_v6  ;;  %v4139_v52 = vld [vmem:[%s5316_s27 + $0xa0] sm:$0xf]  ;;  %v5407_v56 = vld [vmem:[%s6228_s1 + $0x1c] sm:$0xf] }
  0x24   : > { %4699 = vmatpush3.bf16.msra.mxu0 %v606_v50  ;;  %4694 = vmatprep.mubr.msk.bf16.mxu0 %vm266_vm1, %v5148_v34  ;;  %v545_v25 = vrot.slane %v544_v18, 4  ;;  %v571_v26 = vrot.slane %v569_v22, 5  ;;  %v558_v30 = vor.u32 %v557_v21, %v554_v20  ;;  %v575_v32 = vshll.u32 %v463_v19, 16  ;;  %v5150_v58 = vld [vmem:[%s5316_s27 + $0x90] ss:$8 sps:$4 sm:$0xff]  }
  0x25   : > { %5125 = vmatprep.subr.msk.bf16.mxu0 %vm279_vm0, %v4109_v55  ;;  %v536_v33 = vsel %vm5346_vm4, %v531_v23, %v535_v15  ;;  %v4094_v35 = vcombine.low %v508_v27, %v522_v29  ;;  %v563_v36 = vrot.slane %v561_v28, 5  ;;  %v725_v42 = vsel %vm279_vm0, %v4109_v55, 0  ;;  %v5402_v55 = vld [vmem:[%s6228_s1 + $0x18] sm:$0xf]  ;;  %v5414_v61 = vld [vmem:[%s6228_s1 + $0x20] sm:$0xf] }
  0x26   : > { %v572_v31 = vor.u32 %v571_v26, %v568_v24  ;;  %v550_v34 = vsel %vm5346_vm4, %v545_v25, %v549_v16  ;;  %v559_v38 = vrot.slane %v558_v30, 4  ;;  %v577_v41 = vrot.slane %v575_v32, 5  ;;  %v4138_v63 = vld [vmem:[%s5316_s27 + $0x9c] sm:$0x1]  ;;  %v4141_v0 = vld [vmem:[%s5316_s27 + $0xa8] sm:$0xf] }
  0x27   : > { %v4095_v37 = vcombine.low %v536_v33, %v550_v34  ;;  %v936_v50 = vshrl.u32 %v4135_v44, 16  ;;  %v939_v51 = vshll.u32 %v4135_v44, 16  ;;  %v950_v53 = vshrl.u32 %v4137_v45, 16  ;;  %v4140_v4 = vld [vmem:[%s5316_s27 + $0xa4] sm:$0x1] }
  0x28   : > { %v573_v39 = vrot.slane %v572_v31, 4  ;;  %v564_v46 = vsel %vm5346_vm4, %v559_v38, %v563_v36  ;;  %v953_v54 = vshll.u32 %v4137_v45, 16  ;;  %v844_v59 = vsel %vm279_vm0, %v4126_v43, 0  ;;  %v4142_v13 = vld [vmem:[%s5316_s27 + $0xac] sm:$0x1] }
  0x29   : > { %v945_v60 = vshll.u32 %v4136_v48, 16  ;;  %v5418_v62 = vsel %vm279_vm0, %v5396_v49, 0  ;;  %v964_v1 = vshrl.u32 %v4139_v52, 16  ;;  %v938_v2 = vrot.slane %v936_v50, 4  ;;  %v4143_v18 = vld [vmem:[%s5316_s27 + $0xb0] sm:$0xf] }
  0x2a   : > { %v578_v47 = vsel %vm5346_vm4, %v573_v39, %v577_v41  ;;  %v941_v3 = vrot.slane %v939_v51, 5  ;;  %v5429_v6 = vsel %vm279_vm0, %v5407_v56, 0  ;;  %v952_v7 = vrot.slane %v950_v53, 4  ;;  %v5151_v19 = vld [vmem:[%s5316_s27 + $0xa0] ss:$8 sps:$4 sm:$0xff]  }
  0x2b   : > { %4695 = vmatmul.mubr.msk.bf16.gmra.mrb[4].mxu0 %vm266_vm1, %v5149_v5  ;;  %v4096_v57 = vcombine.low %v564_v46, %v578_v47  ;;  %v5425_v5 = vsel %vm279_vm0, %v5402_v55, 0  ;;  %v955_v8 = vrot.slane %v953_v54, 5  ;;  %v967_v9 = vshll.u32 %v4139_v52, 16  ;;  %v4144_v21 = vld [vmem:[%s5316_s27 + $0xb4] sm:$0x1] }
  0x2c   : > { %4700 = vmatprep.mubr.msk.bf16.mxu0 %vm266_vm1, %v4093_v10  ;;  %v5433_v10 = vsel %vm279_vm0, %v5414_v61, 0  ;;  %v5436_v11 = vrot.slane %v945_v60, 5  ;;  %v959_v12 = vshll.u32 %v4138_v63, 16  ;;  %v978_v14 = vshrl.u32 %v4141_v0, 16  ;;  %v4145_v22 = vld [vmem:[%s5316_s27 + $0xb8] sm:$0xf] }
  0x2d   : > { %v981_v15 = vshll.u32 %v4141_v0, 16  ;;  %v966_v16 = vrot.slane %v964_v1, 4  ;;  %v973_v17 = vshll.u32 %v4140_v4, 16  ;;  %v942_v20 = vor.u32 %v941_v3, %v938_v2  ;;  %v4147_v23 = vld [vmem:[%s5316_s27 + $0xc0] sm:$0xf] }
  0x2e   : > { %v956_v24 = vor.u32 %v955_v8, %v952_v7  ;;  %v969_v25 = vrot.slane %v967_v9, 5  ;;  %v987_v26 = vshll.u32 %v4142_v13, 16  ;;  %v4149_v27 = vld [vmem:[%s5316_s27 + $0xc8] sm:$0xf]  ;;  %v980_v28 = vrot.slane %v978_v14, 4 }
  0x2f   : > { %v983_v29 = vrot.slane %v981_v15, 5  ;;  %v992_v30 = vshrl.u32 %v4143_v18, 16  ;;  %v995_v31 = vshll.u32 %v4143_v18, 16  ;;  %v5152_v32 = vld [vmem:[%s5316_s27 + $0xb0] ss:$8 sps:$4 sm:$0xff]   ;;  %v1006_v33 = vshrl.u32 %v4145_v22, 16 }
  0x30   : > { %v1009_v34 = vshll.u32 %v4145_v22, 16  ;;  %v1023_v36 = vshll.u32 %v4147_v23, 16  ;;  %v5449_v38 = vrot.slane %v959_v12, 5  ;;  %v1034_v39 = vshrl.u32 %v4149_v27, 16  ;;  %v4146_v45 = vld [vmem:[%s5316_s27 + $0xbc] sm:$0x1] }
  0x31   : > { %v1037_v41 = vshll.u32 %v4149_v27, 16  ;;  %v5455_v44 = vrot.slane %v987_v26, 5  ;;  %v1001_v46 = vshll.u32 %v4144_v21, 16  ;;  %v970_v47 = vor.u32 %v969_v25, %v966_v16  ;;  %v4148_v52 = vld [vmem:[%s5316_s27 + $0xc4] sm:$0x1] }
  0x32   : > { %v984_v48 = vor.u32 %v983_v29, %v980_v28  ;;  %v994_v50 = vrot.slane %v992_v30, 4  ;;  %v997_v51 = vrot.slane %v995_v31, 5  ;;  %v1008_v53 = vrot.slane %v1006_v33, 4  ;;  %v5153_v60 = vld [vmem:[%s5316_s27 + $0xc0] ss:$8 sps:$4 sm:$0xff]  }
  0x33   : > { %4701 = vmatmul.mubr.msk.bf16.vlgmr.msra.gmra.mrb[0].mxu0 %vm266_vm1, %v4094_v35  ;;  %v1020_v35 = vshrl.u32 %v4147_v23, 16  ;;  %v1011_v54 = vrot.slane %v1009_v34, 5  ;;  %v1036_v63 = vrot.slane %v1034_v39, 4  ;;  %v1039_v0 = vrot.slane %v1037_v41, 5  ;;  %v5154_v1 = vld [vmem:[%s5316_s27 + $0xd8] ss:$8 sps:$4 sm:$0xff]  }
  0x34   : > { %4709 = vmatpush3.bf16.msra.mxu0 %v725_v42  ;;  %4704 = vmatprep.mubr.msk.bf16.mxu0 %vm266_vm1, %v4095_v37  ;;  %v5447_v37 = vrot.slane %v942_v20, 4  ;;  %v5451_v42 = vrot.slane %v956_v24, 4  ;;  %v4150_v2 = vld [vmem:[%s5316_s27 + $0xcc] sm:$0x1]  ;;  %v5466_v3 = vrot.slane %v970_v47, 4  ;;  %v5468_v4 = vrot.slane %v984_v48, 4 }
  0x35   : > { %5126 = vmatprep.subr.msk.bf16.mxu0 %vm279_vm0, %v4126_v43  ;;  %v5453_v43 = vrot.slane %v973_v17, 5  ;;  %v998_v7 = vor.u32 %v997_v51, %v994_v50  ;;  %v1029_v8 = vshll.u32 %v4148_v52, 16  ;;  %v1012_v9 = vor.u32 %v1011_v54, %v1008_v53  ;;  %v4194_v15 = vld [vmem:[%s5316_s27 + $0x8] sm:$0xf]  ;;  %v4196_v16 = vld [vmem:[%s5316_s27 + $0x10] sm:$0xf] }
  0x36   : > { %v1040_v13 = vor.u32 %v1039_v0, %v1036_v63  ;;  %v1043_v14 = vshll.u32 %v4150_v2, 16  ;;  %v4197_v17 = vld [vmem:[%s5316_s27 + $0x14] sm:$0x1]  ;;  %v1404_v18 = vshrl.u32 %v4194_v15, 16  ;;  %v5475_v20 = vrot.slane %v1001_v46, 5 }
  0x37   : > { %v1418_v23 = vshrl.u32 %v4196_v16, 16  ;;  %v4198_v24 = vld [vmem:[%s5316_s27 + $0x18] sm:$0xf]  ;;  %v5481_v25 = vrot.slane %v998_v7, 4  ;;  %v5483_v26 = vrot.slane %v1029_v8, 5  ;;  %v1421_v27 = vshll.u32 %v4196_v16, 16 }
  0x38   : > { %v1427_v28 = vshll.u32 %v4197_v17, 16  ;;  %v4200_v29 = vld [vmem:[%s5316_s27 + $0x20] sm:$0xf]  ;;  %v5155_v30 = vld [vmem:[%s5316_s27 + $0xe8] ss:$8 sps:$4 sm:$0xff]   ;;  %v5487_v31 = vrot.slane %v1012_v9, 4  ;;  %v948_v9 = vsel %vm5346_vm4, %v5447_v37, %v5436_v11 }
  0x39   : > { %v5491_v33 = vrot.slane %v1040_v13, 4  ;;  %v5493_v34 = vrot.slane %v1043_v14, 5  ;;  %v4199_v41 = vld [vmem:[%s5316_s27 + $0x1c] sm:$0x1]  ;;  %v1435_v46 = vshll.u32 %v4198_v24, 16  ;;  %v1420_v48 = vrot.slane %v1418_v23, 4 }
  0x3a   : > { %v1446_v50 = vshrl.u32 %v4200_v29, 16  ;;  %v1449_v51 = vshll.u32 %v4200_v29, 16  ;;  %v4202_v52 = vld [vmem:[%s5316_s27 + $0x28] sm:$0xf]  ;;  %v1423_v53 = vrot.slane %v1421_v27, 5  ;;  %v5500_v54 = vrot.slane %v1427_v28, 5 }
  0x3b   : > { %4705 = vmatmul.mubr.msk.bf16.gmra.mrb[4].mxu0 %vm266_vm1, %v4096_v57  ;;  %v1022_v57 = vrot.slane %v1020_v35, 4  ;;  %v5156_v35 = vld [vmem:[%s5316_s27 + $0xf8] ss:$8 sps:$4 sm:$0xff]   ;;  %v1437_v63 = vrot.slane %v1435_v46, 5  ;;  %v1460_v7 = vshrl.u32 %v4202_v52, 16  ;;  %v1463_v8 = vshll.u32 %v4202_v52, 16 }
  0x3c   : > { %4710 = vmatprep.mubr.msk.bf16.mxu0 %vm266_vm1, %v5150_v58  ;;  %v1025_v58 = vrot.slane %v1023_v36, 5  ;;  %v1406_v36 = vrot.slane %v1404_v18, 4  ;;  %v1448_v0 = vrot.slane %v1446_v50, 4  ;;  %v4203_v13 = vld [vmem:[%s5316_s27 + $0x2c] sm:$0x1]  ;;  %v1424_v16 = vor.u32 %v1423_v53, %v1420_v48 }
  0x3d   : > { %v4205_v14 = vld [vmem:[%s5316_s27 + $0x34] sm:$0x1]  ;;  %v1462_v17 = vrot.slane %v1460_v7, 4  ;;  %v1465_v18 = vrot.slane %v1463_v8, 5  ;;  %v1469_v28 = vshll.u32 %v4203_v13, 16 }
  0x3e   : > { %v1026_v12 = vor.u32 %v1025_v58, %v1022_v57  ;;  %v4201_v57 = vld [vmem:[%s5316_s27 + $0x24] sm:$0x1]  ;;  %v4204_v58 = vld [vmem:[%s5316_s27 + $0x30] sm:$0xf]  ;;  %v4207_v8 = vld [vmem:[%s5316_s27 + $0x3c] sm:$0x1] }
  0x3f   : > { %v1466_v27 = vor.u32 %v1465_v18, %v1462_v17  ;;  %v5160_v7 = vld [vmem:[%s5316_s27 + $0x28] ss:$8 sps:$4 sm:$0xff]   ;;  %v1497_v13 = vshll.u32 %v4207_v8, 16 }
  0x41   : > { %v1467_v50 = vrot.slane %v1466_v27, 4  ;;  %v1499_v18 = vrot.slane %v1497_v13, 5  ;;  %v5166_v27 = vld [vmem:[%s6229_s2 + $0x80] sm:$0xff]  }
  0x42   : > { %4816 = vmatprep.subr.bf16.mxu1 %v5166_v27 }
  0x43   : > { %4711 = vmatmul.mubr.msk.bf16.vlgmr.msra.gmra.mrb[0].mxu0 %vm266_vm1, %v5151_v19  ;;  %v1407_v19 = vshll.u32 %v4194_v15, 16  ;;  %v1474_v15 = vshrl.u32 %v4204_v58, 16  ;;  %4817 = vmatpush3.bf16.msra.mxu1 %v5166_v27 }
  0x44   : > { %4719 = vmatpush3.bf16.msra.mxu0 %v844_v59  ;;  %4714 = vmatprep.mubr.msk.bf16.mxu0 %vm266_vm1, %v5152_v32  ;;  %v1015_v59 = vshll.u32 %v4146_v45, 16  ;;  %v5489_v32 = vrot.slane %v1026_v12, 4  ;;  %v1432_v45 = vshrl.u32 %v4198_v24, 16  ;;  %v1455_v12 = vshll.u32 %v4201_v57, 16 }
  0x45   : > { %5127 = vmatprep.subr.msk.bf16.mxu0 %vm279_vm0, %v5396_v49  ;;  %v4195_v49 = vld [vmem:[%s5316_s27 + $0xc] sm:$0x1]  ;;  %v1409_v39 = vrot.slane %v1407_v19, 5  ;;  %v4206_v19 = vld [vmem:[%s5316_s27 + $0x38] sm:$0xf]  ;;  %v1476_v23 = vrot.slane %v1474_v15, 4  ;;  %v976_v57 = vsel %vm5346_vm4, %v5466_v3, %v5453_v43 }
  0x46   : > { %v5477_v21 = vrot.slane %v1015_v59, 5  ;;  %v1413_v22 = vshll.u32 %v4195_v49, 16  ;;  %v1441_v59 = vshll.u32 %v4199_v41, 16  ;;  %v962_v49 = vsel %vm5346_vm4, %v5451_v42, %v5449_v38  ;;  %v4208_v41 = vld [vmem:[%s5316_s27 + $0x40] sm:$0xf] }
  0x47   : > { %v1410_v2 = vor.u32 %v1409_v39, %v1406_v36  ;;  %v1483_v42 = vshll.u32 %v4205_v14, 16  ;;  %v1425_v36 = vrot.slane %v1424_v16, 4  ;;  %v5525_v39 = vrot.slane %v1455_v12, 5 }
  0x48   : > { %v5497_v47 = vrot.slane %v1413_v22, 5  ;;  %v5157_v22 = vld [vmem:[%s5316_s27 + $0x108] ss:$8 sps:$4 sm:$0xff]   ;;  %v5523_v29 = vrot.slane %v1441_v59, 5  ;;  %v1491_v48 = vshll.u32 %v4206_v19, 16 }
  0x49   : > { %v5521_v24 = vrot.slane %v1410_v2, 4  ;;  %v1485_v52 = vrot.slane %v1483_v42, 5  ;;  %v5169_v42 = vld [vmem:[%s6229_s2 + $0x90] sm:$0xff]  }
  0x4a   : > { %v1493_v43 = vrot.slane %v1491_v48, 5  ;;  %v5178_v48 = vld [vmem:[%s6229_s2 + $0x68] sm:$0xff]  }
  0x4b   : > { %4715 = vmatmul.mubr.msk.bf16.gmra.mrb[4].mxu0 %vm266_vm1, %v5153_v60  ;;  %v1434_v60 = vrot.slane %v1432_v45, 4 }
  0x4c   : > { %4720 = vmatprep.mubr.msk.bf16.mxu0 %vm266_vm1, %v5154_v1  ;;  %v1451_v1 = vrot.slane %v1449_v51, 5  ;;  %v1471_v51 = vrot.slane %v1469_v28, 5  ;;  %v5167_v28 = vld [vmem:[%s6229_s2 + $0x88] sm:$0xff]  }
  0x4d   : > { %v1438_v11 = vor.u32 %v1437_v63, %v1434_v60  ;;  %v1502_v60 = vshrl.u32 %v4208_v41, 16  ;;  %v1505_v63 = vshll.u32 %v4208_v41, 16  ;;  %4818 = vmatprep.subr.bf16.mxu1 %v5167_v28  ;;  %v5174_v41 = vld [vmem:[%s6229_s2 + $0x58] sm:$0xff]  }
  0x4e   : > { %v1452_v37 = vor.u32 %v1451_v1, %v1448_v0  ;;  %v1004_v0 = vsel %vm5346_vm4, %v5481_v25, %v5475_v20  ;;  %v1018_v1 = vsel %vm5346_vm4, %v5487_v31, %v5477_v21  ;;  %v1032_v20 = vsel %vm5346_vm4, %v5489_v32, %v5483_v26  ;;  %v5158_v25 = vld [vmem:[%s5316_s27 + $0x8] ss:$8 sps:$4 sm:$0xff]   ;;  %v5159_v31 = vld [vmem:[%s5316_s27 + $0x18] ss:$8 sps:$4 sm:$0xff]   ;;  %4819 = vmatpush3.bf16.msra.mxu1 %v5167_v28 }
  0x4f   : > { %v5528_v45 = vrot.slane %v1438_v11, 4  ;;  %v4154_v59 = vcombine.low %v1004_v0, %v1018_v1  ;;  %v1046_v21 = vsel %vm5346_vm4, %v5491_v33, %v5493_v34  ;;  %v5161_v26 = vld [vmem:[%s5316_s27 + $0x38] ss:$8 sps:$4 sm:$0xff]   ;;  %v1416_v34 = vsel %vm5346_vm4, %v5521_v24, %v5497_v47  ;;  %4820 = vmatprep.subr.bf16.mxu1 %v5169_v42 }
  0x50   : > { %v5163_v32 = vld [vmem:[%s5316_s27 + $0x60] ss:$8 sps:$4 sm:$0xff]   ;;  %v5164_v33 = vld [vmem:[%s5316_s27 + $0x70] ss:$8 sps:$4 sm:$0xff]  }
  0x51   : > { %v5683_v0 = vld [vmem:[%s6231_s4 + $0x1] ss:$0 sm:$0xff] }
  0x52   : > { %4821 = vmatpush3.bf16.msra.mxu1 %v5169_v42 }
  0x53   : > { %4721 = vmatmul.mubr.msk.bf16.vlgmr.msra.gmra.mrb[0].mxu0 %vm266_vm1, %v5155_v30  ;;  %v1488_v30 = vshrl.u32 %v4206_v19, 16 }
  0x54   : > { %4729 = vmatpush3.bf16.msra.mxu0 %v5418_v62  ;;  %4724 = vmatprep.mubr.msk.bf16.mxu0 %vm266_vm1, %v5156_v35  ;;  %v1477_v62 = vshll.u32 %v4204_v58, 16  ;;  %v4152_v35 = vcombine.low %v948_v9, %v962_v49  ;;  %v990_v58 = vsel %vm5346_vm4, %v5468_v4, %v5455_v44  ;;  %v1504_v44 = vrot.slane %v1502_v60, 4  ;;  %v4209_v9 = vld [vmem:[%s5316_s27 + $0x44] sm:$0x1]  ;;  %v5678_v60 = vld [vmem:[%s6231_s4] ss:$0 sm:$0xff] }
  0x55   : > { %5128 = vmatprep.subr.msk.bf16.mxu0 %vm279_vm0, %v5402_v55  ;;  %v5530_v55 = vrot.slane %v1452_v37, 4  ;;  %v1490_v53 = vrot.slane %v1488_v30, 4  ;;  %v4153_v3 = vcombine.low %v976_v57, %v990_v58  ;;  %v1507_v4 = vrot.slane %v1505_v63, 5  ;;  %v5170_v30 = vld [vmem:[%s6229_s2 + $0x48] sm:$0xff]   ;;  %v5670_v57 = vld [vmem:[%s6229_s2] sm:$0xff]  }
  0x56   : > { %v1479_v38 = vrot.slane %v1477_v62, 5  ;;  %v1511_v15 = vshll.u32 %v4209_v9, 16  ;;  %v1472_v49 = vsel %vm5346_vm4, %v1467_v50, %v1471_v51  ;;  %v5179_v50 = vld [vmem:[%s6229_s2 + $0xb8] sm:$0xff]   ;;  %v5180_v51 = vld [vmem:[%s6229_s2 + $0x70] sm:$0xff]  }
  0x57   : > { %v1458_v47 = vsel %vm5346_vm4, %v5530_v55, %v5525_v39  ;;  %v1494_v14 = vor.u32 %v1493_v43, %v1490_v53  ;;  %v5173_v39 = vld [vmem:[%s6229_s2 + $0xa0] sm:$0xff]   ;;  %v5182_v53 = vld [vmem:[%s6229_s2 + $0x78] sm:$0xff]  }
  0x58   : > { %v1480_v46 = vor.u32 %v1479_v38, %v1476_v23  ;;  %v1513_v37 = vrot.slane %v1511_v15, 5  ;;  %v5262_v38 = vmov 0   ;;  %v5176_v55 = vld [vmem:[%s6229_s2 + $0x60] sm:$0xff]  }
  0x59   : > { %1673 = vst [vmem:[#allocation2 + $0x18] sm:$0xf] %v5262_v38  ;;  %1674 = vst [vmem:[#allocation2 + $0x1c] sm:$0x1] %v5262_v38 }
  0x5a   : > { %v1481_v2 = vrot.slane %v1480_v46, 4  ;;  %1667 = vst [vmem:[#allocation2] sm:$0xf] %v5262_v38  ;;  %1668 = vst [vmem:[#allocation2 + $0x4] sm:$0x1] %v5262_v38  ;;  %v5177_v46 = vld [vmem:[%s6229_s2 + $0xb0] sm:$0xff]  }
  0x5b   : > { %4725 = vmatmul.mubr.msk.bf16.gmra.mrb[4].mxu0 %vm266_vm1, %v5157_v22  ;;  %v1495_v22 = vrot.slane %v1494_v14, 4  ;;  %1669 = vst [vmem:[#allocation2 + $0x8] sm:$0xf] %v5262_v38  ;;  %1670 = vst [vmem:[#allocation2 + $0xc] sm:$0x1] %v5262_v38 }
  0x5c   : > { %4730 = vmatprep.mubr.msk.bf16.mxu0 %vm266_vm1, %v4152_v35  ;;  %v1486_v16 = vsel %vm5346_vm4, %v1481_v2, %v1485_v52  ;;  %1671 = vst [vmem:[#allocation2 + $0x10] sm:$0xf] %v5262_v38  ;;  %1672 = vst [vmem:[#allocation2 + $0x14] sm:$0x1] %v5262_v38  ;;  %v5171_v35 = vld [vmem:[%s6229_s2 + $0x98] sm:$0xff]   ;;  %v5661_v52 = vld [vmem:[%s6229_s2 + $0xc0] sm:$0xff]  }
  0x5d   : > { %v4213_v19 = vcombine.low %v1472_v49, %v1486_v16  ;;  %v1500_v23 = vsel %vm5346_vm4, %v1495_v22, %v1499_v18  ;;  %1675 = vst [vmem:[#allocation2 + $0x20] sm:$0xf] %v5262_v38  ;;  %1676 = vst [vmem:[#allocation2 + $0x24] sm:$0x1] %v5262_v38  ;;  %4822 = vmatprep.subr.bf16.mxu1 %v5171_v35 }
  0x5e   : > { %1677 = vst [vmem:[#allocation2 + $0x28] sm:$0xf] %v5262_v38  ;;  %1678 = vst [vmem:[#allocation2 + $0x2c] sm:$0x1] %v5262_v38  ;;  %4823 = vmatpush3.bf16.msra.mxu1 %v5171_v35 }
  0x5f   : > { %1679 = vst [vmem:[#allocation2 + $0x30] sm:$0xf] %v5262_v38  ;;  %1680 = vst [vmem:[#allocation2 + $0x34] sm:$0x1] %v5262_v38  ;;  %4824 = vmatprep.subr.bf16.mxu1 %v5173_v39 }
  0x60   : > { %1681 = vst [vmem:[#allocation2 + $0x38] sm:$0xf] %v5262_v38  ;;  %1682 = vst [vmem:[#allocation2 + $0x3c] sm:$0x1] %v5262_v38  ;;  %v1821_v35 = vld [vmem:[#allocation2 + $0x1c] sm:$0x1] }
  0x61   : > { %1683 = vst [vmem:[#allocation2 + $0x40] sm:$0xf] %v5262_v38  ;;  %1684 = vst [vmem:[#allocation2 + $0x44] sm:$0x1] %v5262_v38  ;;  %v5673_v58 = vld [vmem:[#allocation2] sm:$0xf] }
  0x62   : > { %1685 = vst [vmem:[#allocation2 + $0x48] sm:$0xf] %v5262_v38  ;;  %1686 = vst [vmem:[#allocation2 + $0x4c] sm:$0x1] %v5262_v38  ;;  %4825 = vmatpush3.bf16.msra.mxu1 %v5173_v39  ;;  %v1887_v1 = vshrl.u32 %v5673_v58, 16 }
  0x63   : > { %4731 = vmatmul.mubr.msk.bf16.vlgmr.msra.gmra.mrb[0].mxu0 %vm266_vm1, %v4153_v3  ;;  %v5687_v3 = vld [vmem:[#allocation2] sm:$0xe] }
  0x64   : > { %4739 = vmatpush3.bf16.msra.mxu0 %v5425_v5  ;;  %4734 = vmatprep.mubr.msk.bf16.mxu0 %vm266_vm1, %v4154_v59  ;;  %v4155_v5 = vcombine.low %v1032_v20, %v1046_v21  ;;  %v1890_v59 = vshll.u32 %v5673_v58, 16 }
  0x65   : > { %5129 = vmatprep.subr.msk.bf16.mxu0 %vm279_vm0, %v5407_v56  ;;  %v5162_v56 = vld [vmem:[%s5316_s27 + $0x50] ss:$8 sps:$4 sm:$0xff]  }
  0x6b   : > { %4735 = vmatmul.mubr.msk.bf16.gmra.mrb[4].mxu0 %vm266_vm1, %v4155_v5  ;;  %v5693_v5 = vld [vmem:[#allocation2 + $0x4] sm:$0x1] }
  0x6c   : > { %4740 = vmatprep.mubr.msk.bf16.mxu0 %vm266_vm1, %v5158_v25  ;;  %v2310_v8 = vrot.slane %v5693_v5, 5 }
  0x73   : > { %4741 = vmatmul.mubr.msk.bf16.vlgmr.msra.gmra.mrb[0].mxu0 %vm266_vm1, %v5159_v31 }
  0x74   : > { %4749 = vmatpush3.bf16.msra.mxu0 %v5429_v6  ;;  %4744 = vmatprep.mubr.msk.bf16.mxu0 %vm266_vm1, %v5160_v7  ;;  %v5165_v6 = vld [vmem:[%s5316_s27 + $0x80] ss:$8 sps:$4 sm:$0xff]  }
  0x75   : > { %5130 = vmatprep.subr.msk.bf16.mxu0 %vm279_vm0, %v5414_v61  ;;  %v1430_v61 = vsel %vm5346_vm4, %v1425_v36, %v5500_v54  ;;  %v1508_v54 = vor.u32 %v1507_v4, %v1504_v44  ;;  %v5172_v36 = vld [vmem:[%s6229_s2 + $0x50] sm:$0xff]  }
  0x76   : > { %v4211_v12 = vcombine.low %v1416_v34, %v1430_v61 }
  0x77   : > { %v1509_v11 = vrot.slane %v1508_v54, 4 }
  0x79   : > { %v1514_v62 = vsel %vm5346_vm4, %v1509_v11, %v1513_v37 }
  0x7a   : > { %v4214_v24 = vcombine.low %v1500_v23, %v1514_v62  ;;  %v1818_v62 = vld [vmem:[#allocation2 + $0x18] sm:$0xf] }
  0x7b   : > { %4745 = vmatmul.mubr.msk.bf16.gmra.mrb[4].mxu0 %vm266_vm1, %v5161_v26  ;;  %v4269_v26 = vrot.slane %v5687_v3, 9 }
  0x7c   : > { %4750 = vmatprep.mubr.msk.bf16.mxu0 %vm266_vm1, %v5162_v56  ;;  %v5698_v56 = vrot.slane %v1887_v1, 4 }
  0x83   : > { %4751 = vmatmul.mubr.msk.bf16.vlgmr.msra.gmra.mrb[0].mxu0 %vm266_vm1, %v5163_v32 }
  0x84   : > { %4759 = vmatpush3.bf16.msra.mxu0 %v5433_v10  ;;  %4754 = vmatprep.mubr.msk.bf16.mxu0 %vm266_vm1, %v5164_v33  ;;  %v1444_v10 = vsel %vm5346_vm4, %v5528_v45, %v5523_v29  ;;  %v5168_v29 = vld [vmem:[%s6229_s2 + $0x40] sm:$0xff]   ;;  %v5175_v45 = vld [vmem:[%s6229_s2 + $0xa8] sm:$0xff]  }
  0x85   : > { %v4212_v17 = vcombine.low %v1444_v10, %v1458_v47  ;;  %4768 = vmatprep.subr.bf16.mxu0 %v5168_v29  ;;  %4826 = vmatprep.subr.bf16.mxu1 %v5175_v45  ;;  %v1896_v10 = vshll.u32 %v5693_v5, 16 }
  0x86   : > { %4827 = vmatpush3.bf16.msra.mxu1 %v5175_v45 }
  0x87   : > { %4828 = vmatprep.subr.bf16.mxu1 %v5177_v46 }
  0x8a   : > { %4829 = vmatpush3.bf16.msra.mxu1 %v5177_v46  ;;  %v1803_v46 = vld [vmem:[#allocation2 + $0x8] sm:$0xf] }
  0x8b   : > { %4755 = vmatmul.mubr.msk.bf16.gmra.mrb[4].mxu0 %vm266_vm1, %v5165_v6  ;;  %4830 = vmatprep.subr.bf16.mxu1 %v5179_v50  ;;  %v5701_v6 = vrot.slane %v1890_v59, 5 }
  0x8c   : > { %4760 = vmatprep.mubr.msk.bf16.mxu0 %vm266_vm1, %v4211_v12 }
  0x8d   : > { %v1893_v18 = vor.u32 %v5701_v6, %v5698_v56  ;;  %v1830_v6 = vld [vmem:[#allocation2 + $0x28] sm:$0xf] }
  0x8e   : > { %4831 = vmatpush3.bf16.msra.mxu1 %v5179_v50 }
  0x8f   : > { %4840 = vmatprep.subr.bf16.mxu1 %v5661_v52 }
  0x93   : > { %4761 = vmatmul.mubr.msk.bf16.vlgmr.msra.gmra.mrb[0].mxu0 %vm266_vm1, %v4212_v17 }
  0x94   : > { %4764 = vmatprep.mubr.msk.bf16.mxu0 %vm266_vm1, %v4213_v19  ;;  %4769 = vmatpush3.bf16.msra.mxu0 %v5168_v29 }
  0x95   : > { %4770 = vmatprep.subr.bf16.mxu0 %v5170_v30 }
  0x98   : > { %4771 = vmatpush3.bf16.msra.mxu0 %v5170_v30 }
  0x99   : > { %4772 = vmatprep.subr.bf16.mxu0 %v5172_v36 }
  0x9b   : > { %4765 = vmatmul.mubr.msk.bf16.gmra.mrb[4].mxu0 %vm266_vm1, %v4214_v24 }
  0x9c   : > { %4773 = vmatpush3.bf16.msra.mxu0 %v5172_v36 }
  0x9d   : > { %4774 = vmatprep.subr.bf16.mxu0 %v5174_v41 }
  0xa0   : > { %4775 = vmatpush3.bf16.msra.mxu0 %v5174_v41 }
  0xa1   : > { %4776 = vmatprep.subr.bf16.mxu0 %v5176_v55 }
  0xa4   : > { %4777 = vmatpush3.bf16.msra.mxu0 %v5176_v55 }
  0xa5   : > { %4778 = vmatprep.subr.bf16.mxu0 %v5178_v48 }
  0xa8   : > { %4779 = vmatpush3.bf16.msra.mxu0 %v5178_v48 }
  0xa9   : > { %4780 = vmatprep.subr.bf16.mxu0 %v5180_v51 }
  0xac   : > { %4781 = vmatpush3.bf16.msra.mxu0 %v5180_v51 }
  0xad   : > { %4782 = vmatprep.subr.bf16.mxu0 %v5182_v53 }
  0xb0   : > { %4783 = vmatpush3.bf16.msra.mxu0 %v5182_v53 }
  0xb1   : > { %4792 = vmatprep.subr.bf16.mxu0 %v5670_v57 }
 0x166   : > { %v4762_v63 = vpop.f32.mrb[0].mxu0 }
 0x167   : > { %v1624_v2 = vmul.f32 %v4762_v63, %v5678_v60  ;;  %v1578_v43 = vpop.f32.mrb[1].mxu0  ;;  %v1809_v63 = vld [vmem:[#allocation2 + $0xc] sm:$0x1] }
 0x168   : > { %v1622_v44 = vmul.f32 %v5678_v60, %v1578_v43  ;;  %v4763_v4 = vpop.f32.mrb[2].mxu0 }
 0x169   : > { %v1637_v20 = vadd.f32 %v5683_v0, %v1624_v2  ;;  %v1625_v21 = vmul.f32 %v4763_v4, %v5678_v60  ;;  %v1581_v25 = vpop.f32.mrb[3].mxu0  ;;  %v1827_v4 = vld [vmem:[#allocation2 + $0x24] sm:$0x1] }
 0x16a   : > { %v1635_v31 = vadd.f32 %v5683_v0, %v1622_v44  ;;  %v1623_v7 = vmul.f32 %v5678_v60, %v1581_v25  ;;  %v1824_v44 = vld [vmem:[#allocation2 + $0x20] sm:$0xf] }
 0x16b   : > { %vm1645_vm8 = vcmp.gt.f32.partialorder %v1637_v20, 0.0  ;;  %v1653_v32 = vmul.f32 0.01, %v1637_v20  ;;  %v1638_v33 = vadd.f32 %v5683_v0, %v1625_v21 }
 0x16c   : > { %vm1643_vm9 = vcmp.gt.f32.partialorder %v1635_v31, 0.0  ;;  %v1651_v34 = vmul.f32 0.01, %v1635_v31  ;;  %v1636_v61 = vadd.f32 %v5683_v0, %v1623_v7 }
 0x16d   : > { %v1661_v9 = vsel %vm1645_vm8, %v1637_v20, %v1653_v32  ;;  %vm1646_vm10 = vcmp.gt.f32.partialorder %v1638_v33, 0.0  ;;  %v1654_v12 = vmul.f32 0.01, %v1638_v33 }
 0x16e   : > { %v4514_v13 = vpack.c.bf16 %v1661_v9, %v1661_v9  ;;  %v1659_v47 = vsel %vm1643_vm9, %v1635_v31, %v1651_v34  ;;  %vm1644_vm11 = vcmp.gt.f32.partialorder %v1636_v61, 0.0  ;;  %v1652_v14 = vmul.f32 0.01, %v1636_v61  ;;  %v4766_v54 = vpop.f32.mrb[4].mxu0  ;;  %v1815_v34 = vld [vmem:[#allocation2 + $0x14] sm:$0x1] }
 0x16f   : > { %v4512_v15 = vpack.c.bf16 %v1659_v47, %v1659_v47  ;;  %v1662_v49 = vsel %vm1646_vm10, %v1638_v33, %v1654_v12  ;;  %v1628_v16 = vmul.f32 %v4766_v54, %v5678_v60  ;;  %v1594_v17 = vpop.f32.mrb[5].mxu0  ;;  %v1812_v33 = vld [vmem:[#allocation2 + $0x10] sm:$0xf] }
 0x170   : > { %v1736_v19 = vshrl.u32 %v4514_v13, 16  ;;  %v1739_v22 = vshll.u32 %v4514_v13, 16  ;;  %v4515_v11 = vpack.c.bf16 %v1662_v49, %v1662_v49  ;;  %v1660_v37 = vsel %vm1644_vm11, %v1636_v61, %v1652_v14  ;;  %v4767_v23 = vpop.f32.mrb[6].mxu0 }
 0x171   : > { %v1720_v24 = vshrl.u32 %v4512_v15, 16  ;;  %v1723_v27 = vshll.u32 %v4512_v15, 16  ;;  %v4513_v28 = vpack.c.bf16 %v1660_v37, %v1660_v37  ;;  %v1641_v29 = vadd.f32 %v5683_v0, %v1628_v16  ;;  %v1597_v38 = vpop.f32.mrb[7].mxu0 }
 0x172   : > { %v1738_v42 = vrot.slane %v1736_v19, 7  ;;  %v1744_v36 = vshrl.u32 %v4515_v11, 16  ;;  %v1747_v39 = vshll.u32 %v4515_v11, 16  ;;  %v1626_v41 = vmul.f32 %v5678_v60, %v1594_v17 }
 0x173   : > { %v1722_v55 = vrot.slane %v1720_v24, 7  ;;  %v1728_v48 = vshrl.u32 %v4513_v28, 16  ;;  %v1731_v50 = vshll.u32 %v4513_v28, 16  ;;  %vm1649_vm2 = vcmp.gt.f32.partialorder %v1641_v29, 0.0  ;;  %v1842_v24 = vld [vmem:[#allocation2 + $0x38] sm:$0xf] }
 0x174   : > { %v1741_v51 = vor.u32 %v1739_v22, %v1738_v42  ;;  %v1742_v53 = vrot.slane %v1738_v42, 4  ;;  %v1746_v1 = vrot.slane %v1744_v36, 7  ;;  %v1657_v2 = vmul.f32 0.01, %v1641_v29  ;;  %v1845_v36 = vld [vmem:[#allocation2 + $0x3c] sm:$0x1] }
 0x175   : > { %v1725_v43 = vor.u32 %v1723_v27, %v1722_v55  ;;  %v1726_v59 = vrot.slane %v1722_v55, 4  ;;  %v1730_v20 = vrot.slane %v1728_v48, 7  ;;  %v1639_v21 = vadd.f32 %v5683_v0, %v1626_v41 }
 0x176   : > { %v1819_v25 = vsel %vm5712_vm14, %v1741_v51, %v1818_v62  ;;  %v1822_v31 = vsel %vm5719_vm15, %v1742_v53, %v1821_v35  ;;  %v1749_v7 = vor.u32 %v1747_v39, %v1746_v1  ;;  %v1750_v32 = vrot.slane %v1746_v1, 4 }
 0x177   : > { %1820 = vst [vmem:[#allocation2 + $0x18] sm:$0xf] %v1819_v25  ;;  %1823 = vst [vmem:[#allocation2 + $0x1c] sm:$0x1] %v1822_v31  ;;  %v1804_v61 = vsel %vm5712_vm14, %v1725_v43, %v1803_v46  ;;  %v1810_v9 = vsel %vm5719_vm15, %v1726_v59, %v1809_v63  ;;  %v1733_v12 = vor.u32 %v1731_v50, %v1730_v20  ;;  %v1734_v13 = vrot.slane %v1730_v20, 4 }
 0x178   : > { %1805 = vst [vmem:[#allocation2 + $0x8] sm:$0xf] %v1804_v61  ;;  %1811 = vst [vmem:[#allocation2 + $0xc] sm:$0x1] %v1810_v9  ;;  %v1825_v47 = vsel %vm5712_vm14, %v1749_v7, %v1824_v44  ;;  %v1828_v14 = vsel %vm5719_vm15, %v1750_v32, %v1827_v4  ;;  %v1665_v54 = vsel %vm1649_vm2, %v1641_v29, %v1657_v2  ;;  %vm1647_vm3 = vcmp.gt.f32.partialorder %v1639_v21, 0.0 }
 0x179   : > { %1826 = vst [vmem:[#allocation2 + $0x20] sm:$0xf] %v1825_v47  ;;  %1829 = vst [vmem:[#allocation2 + $0x24] sm:$0x1] %v1828_v14  ;;  %v1813_v15 = vsel %vm5712_vm14, %v1733_v12, %v1812_v33  ;;  %v1816_v49 = vsel %vm5719_vm15, %v1734_v13, %v1815_v34  ;;  %v4518_v16 = vpack.c.bf16 %v1665_v54, %v1665_v54  ;;  %v1655_v17 = vmul.f32 0.01, %v1639_v21 }
 0x17a   : > { %1814 = vst [vmem:[#allocation2 + $0x10] sm:$0xf] %v1813_v15  ;;  %1817 = vst [vmem:[#allocation2 + $0x14] sm:$0x1] %v1816_v49  ;;  %v1629_v22 = vmul.f32 %v4767_v23, %v5678_v60  ;;  %v1627_v11 = vmul.f32 %v5678_v60, %v1597_v38  ;;  %v5757_v42 = vsel %vm5743_vm5, %v4269_v26, %v2310_v8  ;;  %v5761_v60 = vrot.slane %v1896_v10, 5 }
 0x17b   : > { %v1768_v37 = vshrl.u32 %v4518_v16, 16  ;;  %v1663_v62 = vsel %vm1647_vm3, %v1639_v21, %v1655_v17  ;;  %v1771_v23 = vshll.u32 %v4518_v16, 16  ;;  %v5766_v38 = vrot.slane %v1893_v18, 4  ;;  %v1833_v18 = vld [vmem:[#allocation2 + $0x2c] sm:$0x1] }
 0x17c   : > { %v4516_v27 = vpack.c.bf16 %v1663_v62, %v1663_v62  ;;  %v1642_v28 = vadd.f32 %v5683_v0, %v1629_v22  ;;  %v1640_v29 = vadd.f32 %v5683_v0, %v1627_v11  ;;  %v1848_v61 = vld [vmem:[#allocation2 + $0x40] sm:$0xf]  ;;  %v1851_v9 = vld [vmem:[#allocation2 + $0x44] sm:$0x1]  ;;  %v1836_v15 = vld [vmem:[#allocation2 + $0x30] sm:$0xf] }
 0x17d   : > { %v1770_v35 = vrot.slane %v1768_v37, 7  ;;  %v1899_v4 = vsel %vm5346_vm4, %v5766_v38, %v5761_v60  ;;  %v1839_v49 = vld [vmem:[#allocation2 + $0x34] sm:$0x1]  ;;  %v5188_v60 = vld [vmem:[%s6229_s2 + $0xd8] sm:$0xff]  }
 0x17e   : > { %v1752_v0 = vshrl.u32 %v4516_v27, 16  ;;  %v1755_v39 = vshll.u32 %v4516_v27, 16  ;;  %vm1650_vm6 = vcmp.gt.f32.partialorder %v1642_v28, 0.0  ;;  %v1658_v3 = vmul.f32 0.01, %v1642_v28 }
 0x17f   : > { %v1773_v41 = vor.u32 %v1771_v23, %v1770_v35  ;;  %v1774_v55 = vrot.slane %v1770_v35, 4  ;;  %vm1648_vm7 = vcmp.gt.f32.partialorder %v1640_v29, 0.0  ;;  %v1656_v26 = vmul.f32 0.01, %v1640_v29  ;;  %v1879_v8 = vld [vmem:[#allocation2 + $0xc] sm:$0x1] }
 0x180   : > { %v1754_v46 = vrot.slane %v1752_v0, 7  ;;  %v1666_v48 = vsel %vm1650_vm6, %v1642_v28, %v1658_v3  ;;  %v1910_v50 = vshll.u32 %v1879_v8, 16  ;;  %v2282_v5 = vld [vmem:[#allocation2 + $0x8] sm:$0xe]  ;;  %v2314_v10 = vrot.slane %v1879_v8, 5 }
 0x181   : > { %v1843_v51 = vsel %vm5712_vm14, %v1773_v41, %v1842_v24  ;;  %v1846_v56 = vsel %vm5719_vm15, %v1774_v55, %v1845_v36  ;;  %v4519_v53 = vpack.c.bf16 %v1666_v48, %v1666_v48  ;;  %v1664_v63 = vsel %vm1648_vm7, %v1640_v29, %v1656_v26  ;;  %v1880_v1 = vld [vmem:[#allocation2 + $0x14] sm:$0x1]  ;;  %v5772_v44 = vld [vmem:[#allocation2 + $0x1c] sm:$0x1]  ;;  %v2283_v7 = vld [vmem:[#allocation2 + $0x10] sm:$0xe] }
 0x182   : > { %1844 = vst [vmem:[#allocation2 + $0x38] sm:$0xf] %v1843_v51  ;;  %1847 = vst [vmem:[#allocation2 + $0x3c] sm:$0x1] %v1846_v56  ;;  %v1757_v2 = vor.u32 %v1755_v39, %v1754_v46  ;;  %v1758_v43 = vrot.slane %v1754_v46, 4  ;;  %v4517_v59 = vpack.c.bf16 %v1664_v63, %v1664_v63  ;;  %v5778_v21 = vrot.slane %v1910_v50, 5 }
 0x183   : > { %v1776_v20 = vshrl.u32 %v4519_v53, 16  ;;  %v4270_v25 = vrot.slane %v2282_v5, 9  ;;  %v1924_v31 = vshll.u32 %v1880_v1, 16  ;;  %v1779_v34 = vshll.u32 %v4519_v53, 16  ;;  %v2284_v13 = vld [vmem:[#allocation2 + $0x18] sm:$0xe] }
 0x184   : > { %v1831_v32 = vsel %vm5712_vm14, %v1757_v2, %v1830_v6  ;;  %v1834_v33 = vsel %vm5719_vm15, %v1758_v43, %v1833_v18  ;;  %v1760_v12 = vshrl.u32 %v4517_v59, 16  ;;  %v5784_v47 = vld [vmem:[#allocation2 + $0x8] sm:$0xf]  ;;  %v1763_v54 = vshll.u32 %v4517_v59, 16  ;;  %v5790_v22 = vld [vmem:[#allocation2 + $0x10] sm:$0xf] }
 0x185   : > { %1832 = vst [vmem:[#allocation2 + $0x28] sm:$0xf] %v1831_v32  ;;  %1835 = vst [vmem:[#allocation2 + $0x2c] sm:$0x1] %v1834_v33  ;;  %v1778_v14 = vrot.slane %v1776_v20, 7  ;;  %v2315_v16 = vsel %vm5743_vm5, %v4270_v25, %v2314_v10  ;;  %v5788_v17 = vrot.slane %v1924_v31, 5 }
 0x186   : > { %v1762_v11 = vrot.slane %v1760_v12, 7  ;;  %v4293_v37 = vcombine.low %v5757_v42, %v2315_v16  ;;  %v4271_v62 = vrot.slane %v2283_v7, 9  ;;  %v2318_v24 = vrot.slane %v1880_v1, 5  ;;  %v5797_v3 = vld [vmem:[#allocation2 + $0x18] sm:$0xf]  ;;  %v5183_v18 = vld [vmem:[%s6229_s2 + $0xc8] sm:$0xff]  }
 0x187   : > { %v1781_v27 = vor.u32 %v1779_v34, %v1778_v14  ;;  %v1782_v28 = vrot.slane %v1778_v14, 4  ;;  %v1938_v29 = vshll.u32 %v5772_v44, 16  ;;  %v4272_v35 = vrot.slane %v2284_v13, 9  ;;  %v5805_v8 = vld [vmem:[#allocation2 + $0x24] sm:$0x1] }
 0x188   : > { %v1765_v23 = vor.u32 %v1763_v54, %v1762_v11  ;;  %v1766_v36 = vrot.slane %v1762_v11, 4  ;;  %4832 = vmatprep.mubr.bf16.mxu1 %v4293_v37  ;;  %v2319_v0 = vsel %vm5743_vm5, %v4271_v62, %v2318_v24  ;;  %v2322_v39 = vrot.slane %v5772_v44, 5  ;;  %v2285_v46 = vld [vmem:[#allocation2 + $0x20] sm:$0xe]  ;;  %v5185_v54 = vld [vmem:[%s6229_s2 + $0xd0] sm:$0xff]  }
 0x189   : > { %v1849_v42 = vsel %vm5712_vm14, %v1781_v27, %v1848_v61  ;;  %v1852_v41 = vsel %vm5719_vm15, %v1782_v28, %v1851_v9  ;;  %v1901_v55 = vshrl.u32 %v5784_v47, 16  ;;  %v1904_v26 = vshll.u32 %v5784_v47, 16  ;;  %v5814_v51 = vld [vmem:[#allocation2 + $0x3c] sm:$0x1]  ;;  %v2288_v56 = vld [vmem:[#allocation2 + $0x38] sm:$0xe] }
 0x18a   : > { %1850 = vst [vmem:[#allocation2 + $0x40] sm:$0xf] %v1849_v42  ;;  %1853 = vst [vmem:[#allocation2 + $0x44] sm:$0x1] %v1852_v41  ;;  %v1837_v48 = vsel %vm5712_vm14, %v1765_v23, %v1836_v15  ;;  %v1840_v50 = vsel %vm5719_vm15, %v1766_v36, %v1839_v49  ;;  %v2323_v5 = vsel %vm5743_vm5, %v4272_v35, %v2322_v39  ;;  %v1915_v10 = vshrl.u32 %v5790_v22, 16 }
 0x18b   : > { %1838 = vst [vmem:[#allocation2 + $0x30] sm:$0xf] %v1837_v48  ;;  %1841 = vst [vmem:[#allocation2 + $0x34] sm:$0x1] %v1840_v50  ;;  %v4294_v6 = vcombine.low %v2319_v0, %v2323_v5  ;;  %v1903_v30 = vrot.slane %v1901_v55, 4  ;;  %v1906_v53 = vrot.slane %v1904_v26, 5 }
 0x18c   : > { %v1918_v45 = vshll.u32 %v5790_v22, 16  ;;  %v5820_v63 = vld [vmem:[#allocation2 + $0x20] sm:$0xf]  ;;  %v1917_v1 = vrot.slane %v1915_v10, 4  ;;  %v1929_v2 = vshrl.u32 %v5797_v3, 16  ;;  %v1932_v43 = vshll.u32 %v5797_v3, 16 }
 0x18d   : > { %v5824_v59 = vld [vmem:[#allocation2 + $0x2c] sm:$0x1]  ;;  %v4273_v44 = vrot.slane %v2285_v46, 9  ;;  %4833 = vmatmul.mubr.bf16.vlgmr.msra.gmra.mrb[0].mxu1 %v4294_v6  ;;  %v1907_v20 = vor.u32 %v1906_v53, %v1903_v30  ;;  %v2286_v31 = vld [vmem:[#allocation2 + $0x28] sm:$0xe]  ;;  %v2326_v7 = vrot.slane %v5805_v8, 5 }
 0x18e   : > { %v1920_v25 = vrot.slane %v1918_v45, 5  ;;  %v2330_v32 = vrot.slane %v5824_v59, 5  ;;  %4841 = vmatpush3.bf16.msra.mxu1 %v5661_v52  ;;  %v1931_v33 = vrot.slane %v1929_v2, 4  ;;  %v1934_v34 = vrot.slane %v1932_v43, 5  ;;  %v5842_v28 = vld [vmem:[#allocation2 + $0x28] sm:$0xf] }
 0x18f   : > { %v4274_v61 = vrot.slane %v2286_v31, 9  ;;  %v4276_v9 = vrot.slane %v2288_v56, 9  ;;  %4842 = vmatprep.subr.bf16.mxu1 %v5183_v18  ;;  %v1908_v12 = vrot.slane %v1907_v20, 4  ;;  %v2327_v14 = vsel %vm5743_vm5, %v4273_v44, %v2326_v7  ;;  %v5186_v5 = vld [vmem:[%s6229_s2 + $0x8] sm:$0xff]   ;;  %v5870_v6 = vld [vmem:[#allocation2 + $0x38] sm:$0xf] }
 0x190   : > { %v1921_v13 = vor.u32 %v1920_v25, %v1917_v1  ;;  %v2338_v15 = vrot.slane %v5814_v51, 5  ;;  %v1935_v49 = vor.u32 %v1934_v34, %v1931_v33  ;;  %v1943_v16 = vshrl.u32 %v5820_v63, 16  ;;  %v5187_v53 = vld [vmem:[#allocation2 + $0x8] ss:$8 sps:$4 sm:$0xff]   ;;  %v5191_v43 = vld [vmem:[%s6229_s2 + $0xe0] sm:$0xff]  }
 0x191   : > { %v2331_v52 = vsel %vm5743_vm5, %v4274_v61, %v2330_v32  ;;  %v1946_v11 = vshll.u32 %v5820_v63, 16  ;;  %v1940_v37 = vrot.slane %v1938_v29, 5  ;;  %v1913_v62 = vsel %vm5346_vm4, %v1908_v12, %v5778_v21  ;;  %v5189_v7 = vld [vmem:[%s6229_s2 + $0x10] sm:$0xff]  }
 0x192   : > { %v1922_v24 = vrot.slane %v1921_v13, 4  ;;  %v4295_v27 = vcombine.low %v2327_v14, %v2331_v52  ;;  %v4245_v35 = vcombine.low %v1899_v4, %v1913_v62  ;;  %4843 = vmatpush3.bf16.msra.mxu1 %v5183_v18  ;;  %v1936_v23 = vrot.slane %v1935_v49, 4  ;;  %v1884_v36 = vld [vmem:[#allocation2 + $0x34] sm:$0x1]  ;;  %v2287_v0 = vld [vmem:[#allocation2 + $0x30] sm:$0xe] }
 0x193   : > { %v2339_v29 = vsel %vm5743_vm5, %v4276_v9, %v2338_v15  ;;  %v1945_v39 = vrot.slane %v1943_v16, 4  ;;  %4844 = vmatprep.subr.bf16.mxu1 %v5185_v54  ;;  %v4275_v42 = vrot.slane %v2287_v0, 9  ;;  %v2334_v41 = vrot.slane %v1884_v36, 5  ;;  %v5857_v4 = vld [vmem:[#allocation2 + $0x30] sm:$0xf]  ;;  %v5193_v14 = vld [vmem:[%s6229_s2 + $0xe8] sm:$0xff]  }
 0x194   : > { %v1927_v21 = vsel %vm5346_vm4, %v1922_v24, %v5788_v17  ;;  %4836 = vmatprep.mubr.bf16.mxu1 %v4295_v27  ;;  %v1948_v38 = vrot.slane %v1946_v11, 5  ;;  %4784 = vmatprep.mubr.bf16.mxu0 %v4245_v35  ;;  %v1941_v55 = vsel %vm5346_vm4, %v1936_v23, %v1940_v37  ;;  %v1952_v26 = vshll.u32 %v5805_v8, 16  ;;  %v2666_v24 = vld [vmem:[#allocation2 + $0x10] sm:$0xf] }
 0x195   : > { %v1957_v46 = vshrl.u32 %v5842_v28, 16  ;;  %v1960_v17 = vshll.u32 %v5842_v28, 16  ;;  %v4246_v48 = vcombine.low %v1927_v21, %v1941_v55  ;;  %v2335_v50 = vsel %vm5743_vm5, %v4275_v42, %v2334_v41  ;;  %v5195_v35 = vld [vmem:[%s6229_s2 + $0xf0] sm:$0xff]   ;;  %v5197_v41 = vld [vmem:[%s6229_s2 + $0xf8] sm:$0xff]   ;;  %v5196_v55 = vld [vmem:[%s6229_s2 + $0x28] sm:$0xff]  }
 0x196   : > { %v1949_v10 = vor.u32 %v1948_v38, %v1945_v39  ;;  %v1966_v56 = vshll.u32 %v5824_v59, 16  ;;  %v4296_v18 = vcombine.low %v2335_v50, %v2339_v29  ;;  %4845 = vmatpush3.bf16.msra.mxu1 %v5185_v54  ;;  %v1954_v45 = vrot.slane %v1952_v26, 5  ;;  %v5194_v29 = vld [vmem:[%s6229_s2 + $0x20] sm:$0xff]   ;;  %v5198_v50 = vld [vmem:[%s6229_s2 + $0x30] sm:$0xff]  }
 0x197   : > { %v1959_v8 = vrot.slane %v1957_v46, 4  ;;  %v1962_v30 = vrot.slane %v1960_v17, 5  ;;  %4785 = vmatmul.mubr.bf16.vlgmr.msra.gmra.mrb[8].mxu0 %v4246_v48  ;;  %4846 = vmatprep.subr.bf16.mxu1 %v5188_v60  ;;  %v1971_v1 = vshrl.u32 %v5857_v4, 16  ;;  %v1974_v2 = vshll.u32 %v5857_v4, 16  ;;  %v5915_v48 = vld [vmem:[#allocation2 + $0x14] sm:$0x1] }
 0x198   : > { %4793 = vmatpush3.bf16.msra.mxu0 %v5670_v57  ;;  %4837 = vmatmul.mubr.bf16.gmra.mrb[4].mxu1 %v4296_v18  ;;  %v1950_v59 = vrot.slane %v1949_v10, 4  ;;  %v1985_v20 = vshrl.u32 %v5870_v6, 16  ;;  %v1988_v25 = vshll.u32 %v5870_v6, 16  ;;  %v1968_v31 = vrot.slane %v1966_v56, 5  ;;  %v5920_v10 = vld [vmem:[#allocation2 + $0xc] sm:$0x1] }
 0x199   : > { %v1963_v44 = vor.u32 %v1962_v30, %v1959_v8  ;;  %4794 = vmatprep.subr.bf16.mxu0 %v5186_v5  ;;  %4856 = vmatprep.mubr.bf16.mxu1 %v5187_v53  ;;  %v1973_v32 = vrot.slane %v1971_v1, 4  ;;  %v1976_v33 = vrot.slane %v1974_v2, 5  ;;  %v1980_v34 = vshll.u32 %v1884_v36, 16  ;;  %v2664_v36 = vld [vmem:[#allocation2 + $0x8] sm:$0xf] }
 0x19a   : > { %4847 = vmatpush3.bf16.msra.mxu1 %v5188_v60  ;;  %v1987_v57 = vrot.slane %v1985_v20, 4  ;;  %v1990_v9 = vrot.slane %v1988_v25, 5  ;;  %v1994_v12 = vshll.u32 %v5814_v51, 16  ;;  %v1955_v54 = vsel %vm5346_vm4, %v1950_v59, %v1954_v45  ;;  %v5192_v51 = vld [vmem:[%s6229_s2 + $0x18] sm:$0xff]   ;;  %v5203_v18 = vld [vmem:[%s6229_s2 + $0x108] sm:$0xff]  }
 0x19b   : > { %v1964_v61 = vrot.slane %v1963_v44, 4  ;;  %v1977_v13 = vor.u32 %v1976_v33, %v1973_v32  ;;  %4848 = vmatprep.subr.bf16.mxu1 %v5191_v43  ;;  %v1982_v11 = vrot.slane %v1980_v34, 5  ;;  %v2695_v39 = vshrl.u32 %v2666_v24, 16  ;;  %v5199_v56 = vld [vmem:[#allocation2 + $0x18] ss:$8 sps:$4 sm:$0xff]  }
 0x19c   : > { %4795 = vmatpush3.bf16.msra.mxu0 %v5186_v5  ;;  %v1991_v49 = vor.u32 %v1990_v9, %v1987_v57  ;;  %v1996_v62 = vrot.slane %v1994_v12, 5  ;;  %v2698_v21 = vshll.u32 %v2666_v24, 16  ;;  %v4257_v42 = vcombine.low %v5673_v58, %v5784_v47  ;;  %v5200_v58 = vld [vmem:[%s6229_s2 + $0x100] sm:$0xff]   ;;  %v5201_v53 = vld [vmem:[#allocation2 + $0x28] ss:$8 sps:$4 sm:$0xff]   ;;  %v5202_v45 = vld [vmem:[%s6229_s2 + $0x38] sm:$0xff]  }
 0x19d   : > { %v1969_v15 = vsel %vm5346_vm4, %v1964_v61, %v1968_v31  ;;  %4796 = vmatprep.subr.bf16.mxu0 %v5189_v7  ;;  %v1978_v16 = vrot.slane %v1977_v13, 4  ;;  %v2681_v60 = vshrl.u32 %v2664_v36, 16  ;;  %v2684_v38 = vshll.u32 %v2664_v36, 16  ;;  %v5206_v31 = vld [vmem:[#allocation2 + $0x38] ss:$8 sps:$4 sm:$0xff]  }
 0x19e   : > { %v4247_v52 = vcombine.low %v1955_v54, %v1969_v15  ;;  %v1992_v37 = vrot.slane %v1991_v49, 4  ;;  %4849 = vmatpush3.bf16.msra.mxu1 %v5191_v43  ;;  %v2697_v26 = vrot.slane %v2695_v39, 4  ;;  %v2700_v46 = vrot.slane %v2698_v21, 5  ;;  %v5207_v43 = vld [vmem:[%s6229_s2 + $0x110] sm:$0xff]   ;;  %v5208_v32 = vld [vmem:[%s6229_s2 + $0x118] sm:$0xff]   ;;  %v5210_v12 = vld [vmem:[%s6229_s2 + $0x120] sm:$0xff]  }
 0x19f   : > { %v1983_v27 = vsel %vm5346_vm4, %v1978_v16, %v1982_v11  ;;  %4850 = vmatprep.subr.bf16.mxu1 %v5193_v14  ;;  %v2683_v47 = vrot.slane %v2681_v60, 4  ;;  %v2686_v17 = vrot.slane %v2684_v38, 5  ;;  %v2704_v30 = vshll.u32 %v5915_v48, 16  ;;  %v2670_v61 = vld [vmem:[#allocation2 + $0x20] sm:$0xf] }
 0x1a0   : > { %4788 = vmatprep.mubr.bf16.mxu0 %v4247_v52  ;;  %v1997_v23 = vsel %vm5346_vm4, %v1992_v37, %v1996_v62  ;;  %4797 = vmatpush3.bf16.msra.mxu0 %v5189_v7  ;;  %v2701_v5 = vor.u32 %v2700_v46, %v2697_v26  ;;  %v2690_v1 = vshll.u32 %v5920_v10, 16  ;;  %v4258_v34 = vcombine.low %v5790_v22, %v5797_v3  ;;  %v2674_v9 = vld [vmem:[#allocation2 + $0x30] sm:$0xf]  ;;  %v2668_v13 = vld [vmem:[#allocation2 + $0x18] sm:$0xf] }
 0x1a1   : > { %v4248_v0 = vcombine.low %v1983_v27, %v1997_v23  ;;  %4798 = vmatprep.subr.bf16.mxu0 %v5192_v51  ;;  %v2687_v8 = vor.u32 %v2686_v17, %v2683_v47  ;;  %v2706_v44 = vrot.slane %v2704_v30, 5  ;;  %v4259_v57 = vcombine.low %v5820_v63, %v5842_v28  ;;  %v2672_v15 = vld [vmem:[#allocation2 + $0x28] sm:$0xf]  ;;  %v2678_v27 = vld [vmem:[#allocation2 + $0x40] sm:$0xf] }
 0x1a2   : > { %4851 = vmatpush3.bf16.msra.mxu1 %v5193_v14  ;;  %v2702_v2 = vrot.slane %v2701_v5, 4  ;;  %v2692_v20 = vrot.slane %v2690_v1, 5  ;;  %v2723_v14 = vshrl.u32 %v2670_v61, 16  ;;  %v2726_v54 = vshll.u32 %v2670_v61, 16  ;;  %v5211_v63 = vld [vmem:[%s6229_s2 + $0x128] sm:$0xff]  }
 0x1a3   : > { %4789 = vmatmul.mubr.bf16.gmra.mrb[12].mxu0 %v4248_v0  ;;  %4852 = vmatprep.subr.bf16.mxu1 %v5195_v35  ;;  %v2688_v59 = vrot.slane %v2687_v8, 4  ;;  %v2751_v22 = vshrl.u32 %v2674_v9, 16  ;;  %v2754_v3 = vshll.u32 %v2674_v9, 16  ;;  %v2709_v49 = vshrl.u32 %v2668_v13, 16  ;;  %v3853_v0 = vld [vmem:[%s6230_s3] sm:$0xf] }
 0x1a4   : > { %4808 = vmatprep.mubr.bf16.mxu0 %v4257_v42  ;;  %4799 = vmatpush3.bf16.msra.mxu0 %v5192_v51  ;;  %v2707_v25 = vsel %vm5346_vm4, %v2702_v2, %v2706_v44  ;;  %v2712_v52 = vshll.u32 %v2668_v13, 16  ;;  %v2737_v28 = vshrl.u32 %v2672_v15, 16  ;;  %v2740_v16 = vshll.u32 %v2672_v15, 16  ;;  %v5960_v42 = vld [vmem:[#allocation2 + $0x34] sm:$0x1] }
 0x1a5   : > { %4800 = vmatprep.subr.bf16.mxu0 %v5194_v29  ;;  %v2693_v7 = vsel %vm5346_vm4, %v2688_v59, %v2692_v20  ;;  %v2725_v11 = vrot.slane %v2723_v14, 4  ;;  %v2728_v51 = vrot.slane %v2726_v54, 5  ;;  %v4260_v37 = vcombine.low %v5857_v4, %v5870_v6  ;;  %v2676_v6 = vld [vmem:[#allocation2 + $0x38] sm:$0xf]  ;;  %v5963_v38 = vld [vmem:[#allocation2 + $0x1c] sm:$0x1] }
 0x1a6   : > { %4853 = vmatpush3.bf16.msra.mxu1 %v5195_v35  ;;  %v4349_v33 = vcombine.low %v2693_v7, %v2707_v25  ;;  %v2753_v62 = vrot.slane %v2751_v22, 4  ;;  %v2756_v24 = vrot.slane %v2754_v3, 5  ;;  %v5212_v35 = vld [vmem:[%s6229_s2 + $0x130] sm:$0xff]   ;;  %v2711_v23 = vrot.slane %v2709_v49, 4  ;;  %v5214_v20 = vld [vmem:[%s6229_s2 + $0x140] sm:$0xff]  }
 0x1a7   : > { %4854 = vmatprep.subr.bf16.mxu1 %v5197_v41  ;;  %v2714_v36 = vrot.slane %v2712_v52, 5  ;;  %v2739_v39 = vrot.slane %v2737_v28, 4  ;;  %v2742_v4 = vrot.slane %v2740_v16, 5  ;;  %v2729_v21 = vor.u32 %v2728_v51, %v2725_v11  ;;  %v5977_v7 = vld [vmem:[#allocation2 + $0x44] sm:$0x1] }
 0x1a8   : > { %4801 = vmatpush3.bf16.msra.mxu0 %v5194_v29  ;;  %v5958_v29 = vld [vmem:[#allocation2 + $0x24] sm:$0x1]  ;;  %v2782_v60 = vshll.u32 %v2678_v27, 16  ;;  %v2765_v47 = vshrl.u32 %v2676_v6, 16  ;;  %v2768_v17 = vshll.u32 %v2676_v6, 16  ;;  %v3887_v61 = vsel %vm279_vm0, %v3853_v0, 0 }
 0x1a9   : > { %4802 = vmatprep.subr.bf16.mxu0 %v5196_v55  ;;  %v2715_v26 = vor.u32 %v2714_v36, %v2711_v23  ;;  %v2732_v46 = vshll.u32 %v5958_v29, 16  ;;  %v2743_v5 = vor.u32 %v2742_v4, %v2739_v39  ;;  %v2730_v8 = vrot.slane %v2729_v21, 4  ;;  %v2947_v13 = vld [vmem:[#allocation2 + $0x10] sm:$0xe]  ;;  %v5250_v22 = vld [vmem:[%s5316_s27 + $0xd8] ss:$8 sps:$4 sm:$0xff]  }
 0x1aa   : > { %4855 = vmatpush3.bf16.msra.mxu1 %v5197_v41  ;;  %v2779_v41 = vshrl.u32 %v2678_v27, 16  ;;  %v2767_v59 = vrot.slane %v2765_v47, 4  ;;  %v2770_v44 = vrot.slane %v2768_v17, 5  ;;  %v2788_v15 = vshll.u32 %v5977_v7, 16  ;;  %v5251_v3 = vld [vmem:[%s5316_s27 + $0xe8] ss:$8 sps:$4 sm:$0xff]  }
 0x1ab   : > { %4864 = vmatprep.subr.bf16.mxu1 %v5200_v58  ;;  %v2716_v2 = vrot.slane %v2715_v26, 4  ;;  %v2744_v25 = vrot.slane %v2743_v5, 4  ;;  %v2946_v51 = vld [vmem:[#allocation2 + $0x8] sm:$0xe]  ;;  %v5216_v23 = vld [vmem:[%s6229_s2 + $0x150] sm:$0xff]   ;;  %v5218_v26 = vld [vmem:[%s6229_s2 + $0x160] sm:$0xff]  }
 0x1ac   : > { %4803 = vmatpush3.bf16.msra.mxu0 %v5196_v55  ;;  %v2757_v55 = vor.u32 %v2756_v24, %v2753_v62  ;;  %v2781_v30 = vrot.slane %v2779_v41, 4  ;;  %v2771_v54 = vor.u32 %v2770_v44, %v2767_v59  ;;  %v2976_v62 = vrot.slane %v5915_v48, 5  ;;  %v5253_v6 = vld [vmem:[%s5316_s27 + $0x108] ss:$8 sps:$4 sm:$0xff]   ;;  %v2949_v17 = vld [vmem:[#allocation2 + $0x20] sm:$0xe] }
 0x1ad   : > { %4804 = vmatprep.subr.bf16.mxu0 %v5198_v50  ;;  %4857 = vmatmul.mubr.bf16.vlgmr.msra.gmra.mrb[0].mxu1 %v5199_v56  ;;  %v2760_v56 = vshll.u32 %v5960_v42, 16  ;;  %v2790_v27 = vrot.slane %v2788_v15, 5  ;;  %v4361_v36 = vrot.slane %v2946_v51, 9  ;;  %v5220_v47 = vld [vmem:[%s6229_s2 + $0x170] sm:$0xff]   ;;  %v5221_v5 = vld [vmem:[%s6229_s2 + $0x178] sm:$0xff]  }
 0x1ae   : > { %4860 = vmatprep.mubr.bf16.mxu1 %v5201_v53  ;;  %4865 = vmatpush3.bf16.msra.mxu1 %v5200_v58  ;;  %v5966_v58 = vld [vmem:[#allocation2 + $0x2c] sm:$0x1]  ;;  %v2784_v53 = vrot.slane %v2782_v60, 5  ;;  %v2758_v1 = vrot.slane %v2757_v55, 4  ;;  %v2772_v24 = vrot.slane %v2771_v54, 4 }
 0x1af   : > { %4866 = vmatprep.subr.bf16.mxu1 %v5203_v18  ;;  %v2988_v44 = vrot.slane %v5966_v58, 5 }
 0x1b0   : > { %4805 = vmatpush3.bf16.msra.mxu0 %v5198_v50  ;;  %v5213_v50 = vld [vmem:[%s6229_s2 + $0x138] sm:$0xff]  }
 0x1b1   : > { %4806 = vmatprep.subr.bf16.mxu0 %v5202_v45 }
 0x1b2   : > { %4867 = vmatpush3.bf16.msra.mxu1 %v5203_v18  ;;  %v2718_v18 = vshll.u32 %v5963_v38, 16 }
 0x1b3   : > { %4868 = vmatprep.subr.bf16.mxu1 %v5207_v43 }
 0x1b4   : > { %4807 = vmatpush3.bf16.msra.mxu0 %v5202_v45  ;;  %v2746_v45 = vshll.u32 %v5966_v58, 16  ;;  %v5223_v58 = vld [vmem:[%s6229_s2 + $0x188] sm:$0xff]  }
 0x1b5   : > { %4861 = vmatmul.mubr.bf16.gmra.mrb[4].mxu1 %v5206_v31  ;;  %5131 = vmatprep.subr.msk.bf16.mxu0 %vm279_vm0, %v3853_v0  ;;  %v2762_v31 = vrot.slane %v2760_v56, 5  ;;  %v2972_v0 = vrot.slane %v5920_v10, 5  ;;  %v5217_v10 = vld [vmem:[%s6229_s2 + $0x158] sm:$0xff]  }
 0x1b6   : > { %4869 = vmatpush3.bf16.msra.mxu1 %v5207_v43  ;;  %4880 = vmatprep.mubr.bf16.mxu1 %v4349_v33  ;;  %v2734_v43 = vrot.slane %v2732_v46, 5  ;;  %v5219_v46 = vld [vmem:[%s6229_s2 + $0x168] sm:$0xff]   ;;  %v2948_v56 = vld [vmem:[#allocation2 + $0x18] sm:$0xe] }
 0x1b7   : > { %4809 = vmatmul.mubr.bf16.vlgmr.msra.gmra.mrb[8].mxu0 %v4258_v34  ;;  %4870 = vmatprep.subr.bf16.mxu1 %v5208_v32  ;;  %v2785_v34 = vor.u32 %v2784_v53, %v2781_v30  ;;  %v2763_v9 = vsel %vm5346_vm4, %v2758_v1, %v2762_v31  ;;  %v2973_v60 = vsel %vm5743_vm5, %v4361_v36, %v2972_v0  ;;  %v2950_v30 = vld [vmem:[#allocation2 + $0x28] sm:$0xe]  ;;  %v4363_v1 = vrot.slane %v2948_v56, 9  ;;  %v6076_v36 = vld [vmem:[#allocation2 + $0x14] sm:$0x1]  ;;  %v5237_v56 = vld [vmem:[%s6229_s2 + $0x1d8] sm:$0xff]  }
 0x1b8   : > { %4812 = vmatprep.mubr.bf16.mxu0 %v4259_v57  ;;  %v2735_v33 = vsel %vm5346_vm4, %v2730_v8, %v2734_v43  ;;  %v2748_v57 = vrot.slane %v2746_v45, 5  ;;  %4985 = vmatpush3.bf16.msra.mxu0 %v3887_v61  ;;  %v2984_v8 = vrot.slane %v5958_v29, 5  ;;  %v2992_v45 = vrot.slane %v5960_v42, 5  ;;  %v5222_v43 = vld [vmem:[%s6229_s2 + $0x180] sm:$0xff]  }
 0x1b9   : > { %v2786_v11 = vrot.slane %v2785_v34, 4  ;;  %v4365_v59 = vrot.slane %v2950_v30, 9  ;;  %v3000_v61 = vrot.slane %v5977_v7, 5  ;;  %v5226_v7 = vld [vmem:[%s6229_s2 + $0x198] sm:$0xff]   ;;  %v3335_v30 = vld [vmem:[#allocation2 + $0x30] sm:$0xf] }
 0x1ba   : > { %4871 = vmatpush3.bf16.msra.mxu1 %v5208_v32  ;;  %v2720_v32 = vrot.slane %v2718_v18, 5  ;;  %v2749_v52 = vsel %vm5346_vm4, %v2744_v25, %v2748_v57  ;;  %v4364_v18 = vrot.slane %v2949_v17, 9  ;;  %v2953_v25 = vld [vmem:[#allocation2 + $0x40] sm:$0xe] }
 0x1bb   : > { %4872 = vmatprep.subr.bf16.mxu1 %v5210_v12  ;;  %v4351_v28 = vcombine.low %v2749_v52, %v2763_v9  ;;  %v2791_v4 = vsel %vm5346_vm4, %v2786_v11, %v2790_v27  ;;  %v2989_v31 = vsel %vm5743_vm5, %v4365_v59, %v2988_v44  ;;  %v4368_v34 = vrot.slane %v2953_v25, 9  ;;  %v5229_v52 = vld [vmem:[%s6229_s2 + $0x1b0] sm:$0xff]   ;;  %v5230_v11 = vld [vmem:[%s6229_s2 + $0x1b8] sm:$0xff]   ;;  %v5232_v27 = vld [vmem:[%s6229_s2 + $0x1c0] sm:$0xff]  }
 0x1bc   : > { %v2721_v14 = vsel %vm5346_vm4, %v2716_v2, %v2720_v32  ;;  %v2980_v2 = vrot.slane %v5963_v38, 5  ;;  %v2952_v32 = vld [vmem:[#allocation2 + $0x38] sm:$0xe]  ;;  %v3400_v59 = vshrl.u32 %v3335_v30, 16  ;;  %v3403_v44 = vshll.u32 %v3335_v30, 16  ;;  %v5239_v25 = vld [vmem:[%s6229_s2 + $0x1e8] sm:$0xff]  }
 0x1bd   : > { %v4350_v49 = vcombine.low %v2721_v14, %v2735_v33  ;;  %v4367_v57 = vrot.slane %v2952_v32, 9  ;;  %v3001_v14 = vsel %vm5743_vm5, %v4368_v34, %v3000_v61  ;;  %v3339_v61 = vld [vmem:[#allocation2 + $0x40] sm:$0xf] }
 0x1be   : > { %4873 = vmatpush3.bf16.msra.mxu1 %v5210_v12  ;;  %v5984_v12 = vld [vmem:[#allocation2 + $0x3c] sm:$0x1]  ;;  %v2981_v42 = vsel %vm5743_vm5, %v4363_v1, %v2980_v2  ;;  %v3405_v34 = vrot.slane %v3403_v44, 5 }
 0x1bf   : > { %4813 = vmatmul.mubr.bf16.gmra.mrb[12].mxu0 %v4260_v37  ;;  %4874 = vmatprep.subr.bf16.mxu1 %v5211_v63  ;;  %v2774_v16 = vshll.u32 %v5984_v12, 16  ;;  %v4362_v37 = vrot.slane %v2947_v13, 9  ;;  %v2996_v9 = vrot.slane %v5984_v12, 5  ;;  %v5224_v13 = vld [vmem:[%s6229_s2 + $0x190] sm:$0xff]   ;;  %v5227_v12 = vld [vmem:[%s6229_s2 + $0x1a0] sm:$0xff]  }
 0x1c0   : > { %4986 = vmatprep.mubr.msk.bf16.mxu0 %vm266_vm1, %v5250_v22  ;;  %v5225_v22 = vld [vmem:[#allocation2 + $0x10] ss:$8 sps:$4 sm:$0xff]  }
 0x1c1   : > { %v2776_v39 = vrot.slane %v2774_v16, 5  ;;  %v2977_v48 = vsel %vm5743_vm5, %v4362_v37, %v2976_v62  ;;  %v2997_v54 = vsel %vm5743_vm5, %v4367_v57, %v2996_v9 }
 0x1c2   : > { %4875 = vmatpush3.bf16.msra.mxu1 %v5211_v63  ;;  %v5215_v63 = vld [vmem:[%s6229_s2 + $0x148] sm:$0xff]   ;;  %v4385_v55 = vcombine.low %v2973_v60, %v2977_v48  ;;  %v4388_v15 = vcombine.low %v2997_v54, %v3001_v14  ;;  %v5240_v14 = vld [vmem:[%s6229_s2 + $0x1f0] sm:$0xff]  }
 0x1c3   : > { %4876 = vmatprep.subr.bf16.mxu1 %v5212_v35  ;;  %v2777_v21 = vsel %vm5346_vm4, %v2772_v24, %v2776_v39  ;;  %v6078_v39 = vld [vmem:[#allocation2 + $0x1c] sm:$0x1]  ;;  %v5234_v48 = vld [vmem:[%s6229_s2 + $0x1c8] sm:$0xff]  }
 0x1c4   : > { %v4352_v41 = vcombine.low %v2777_v21, %v2791_v4  ;;  %v5231_v4 = vld [vmem:[#allocation2 + $0x20] ss:$8 sps:$4 sm:$0xff]   ;;  %v6104_v54 = vld [vmem:[#allocation2 + $0x2c] sm:$0x1] }
 0x1c6   : > { %4877 = vmatpush3.bf16.msra.mxu1 %v5212_v35  ;;  %v5252_v35 = vld [vmem:[%s5316_s27 + $0xf8] ss:$8 sps:$4 sm:$0xff]  }
 0x1c7   : > { %4878 = vmatprep.subr.bf16.mxu1 %v5213_v50  ;;  %4987 = vmatmul.mubr.msk.bf16.vlgmr.msra.gmra.mrb[16].mxu0 %vm266_vm1, %v5251_v3  ;;  %v5228_v3 = vld [vmem:[%s6229_s2 + $0x1a8] sm:$0xff]  }
 0x1c8   : > { %4990 = vmatprep.mubr.msk.bf16.mxu0 %vm266_vm1, %v5252_v35 }
 0x1ca   : > { %4879 = vmatpush3.bf16.msra.mxu1 %v5213_v50  ;;  %v2951_v50 = vld [vmem:[#allocation2 + $0x30] sm:$0xe] }
 0x1cb   : > { %4888 = vmatprep.subr.bf16.mxu1 %v5214_v20  ;;  %v4366_v53 = vrot.slane %v2951_v50, 9  ;;  %v5235_v50 = vld [vmem:[#allocation2 + $0x40] ss:$8 sps:$4 sm:$0xff]  }
 0x1cd   : > { %4881 = vmatmul.mubr.bf16.vlgmr.msra.gmra.mrb[0].mxu1 %v4350_v49  ;;  %v2993_v29 = vsel %vm5743_vm5, %v4366_v53, %v2992_v45  ;;  %v3327_v49 = vld [vmem:[#allocation2 + $0x10] sm:$0xf]  ;;  %v5238_v53 = vld [vmem:[%s6229_s2 + $0x1e0] sm:$0xff]  }
 0x1ce   : > { %4884 = vmatprep.mubr.bf16.mxu1 %v4351_v28  ;;  %4889 = vmatpush3.bf16.msra.mxu1 %v5214_v20  ;;  %v2985_v20 = vsel %vm5743_vm5, %v4364_v18, %v2984_v8  ;;  %v4387_v33 = vcombine.low %v2989_v31, %v2993_v29  ;;  %v3344_v28 = vshrl.u32 %v3327_v49, 16  ;;  %v3347_v16 = vshll.u32 %v3327_v49, 16  ;;  %v3333_v8 = vld [vmem:[#allocation2 + $0x28] sm:$0xf]  ;;  %v3331_v45 = vld [vmem:[#allocation2 + $0x20] sm:$0xf] }
 0x1cf   : > { %4890 = vmatprep.subr.bf16.mxu1 %v5215_v63  ;;  %4991 = vmatmul.mubr.msk.bf16.gmra.mrb[20].mxu0 %vm266_vm1, %v5253_v6  ;;  %v4386_v38 = vcombine.low %v2981_v42, %v2985_v20  ;;  %v3353_v6 = vshll.u32 %v6076_v36, 16  ;;  %v3386_v1 = vshrl.u32 %v3333_v8, 16  ;;  %v3389_v2 = vshll.u32 %v3333_v8, 16  ;;  %v3341_v31 = vld [vmem:[#allocation2 + $0x48] sm:$0xf] }
 0x1d0   : > { %v3346_v62 = vrot.slane %v3344_v28, 4  ;;  %v3349_v24 = vrot.slane %v3347_v16, 5  ;;  %v3372_v20 = vshrl.u32 %v3331_v45, 16  ;;  %v3375_v29 = vshll.u32 %v3331_v45, 16 }
 0x1d1   : > { %v3391_v32 = vrot.slane %v3389_v2, 5  ;;  %v3428_v49 = vshrl.u32 %v3339_v61, 16 }
 0x1d2   : > { %4891 = vmatpush3.bf16.msra.mxu1 %v5215_v63  ;;  %v3329_v63 = vld [vmem:[#allocation2 + $0x18] sm:$0xf]  ;;  %v3350_v0 = vor.u32 %v3349_v24, %v3346_v62  ;;  %v3374_v57 = vrot.slane %v3372_v20, 4  ;;  %v3377_v9 = vrot.slane %v3375_v29, 5 }
 0x1d3   : > { %4892 = vmatprep.subr.bf16.mxu1 %v5216_v23  ;;  %v3358_v51 = vshrl.u32 %v3329_v63, 16  ;;  %v3361_v37 = vshll.u32 %v3329_v63, 16  ;;  %v6108_v63 = vld [vmem:[#allocation2 + $0x24] sm:$0x1] }
 0x1d4   : > { %v3351_v60 = vrot.slane %v3350_v0, 4  ;;  %v3378_v16 = vor.u32 %v3377_v9, %v3374_v57 }
 0x1d5   : > { %4885 = vmatmul.mubr.bf16.gmra.mrb[4].mxu1 %v4352_v41  ;;  %v3360_v35 = vrot.slane %v3358_v51, 4  ;;  %v5233_v41 = vld [vmem:[#allocation2 + $0x30] ss:$8 sps:$4 sm:$0xff]   ;;  %v6111_v51 = vld [vmem:[#allocation2 + $0x3c] sm:$0x1] }
 0x1d6   : > { %4893 = vmatpush3.bf16.msra.mxu1 %v5216_v23  ;;  %4904 = vmatprep.mubr.bf16.mxu1 %v4385_v55  ;;  %v3363_v23 = vrot.slane %v3361_v37, 5  ;;  %v5236_v55 = vld [vmem:[%s6229_s2 + $0x1d0] sm:$0xff]   ;;  %v5241_v37 = vld [vmem:[%s6229_s2 + $0x1f8] sm:$0xff]  }
 0x1d7   : > { %4894 = vmatprep.subr.bf16.mxu1 %v5217_v10 }
 0x1d8   : > { %v3364_v21 = vor.u32 %v3363_v23, %v3360_v35  ;;  %v3381_v23 = vshll.u32 %v6108_v63, 16 }
 0x1da   : > { %4895 = vmatpush3.bf16.msra.mxu1 %v5217_v10  ;;  %v3367_v10 = vshll.u32 %v6078_v39, 16 }
 0x1db   : > { %4896 = vmatprep.subr.bf16.mxu1 %v5218_v26 }
 0x1dc   : > { %v3369_v17 = vrot.slane %v3367_v10, 5  ;;  %v6119_v10 = vld [vmem:[#allocation2 + $0x4c] sm:$0x1] }
 0x1de   : > { %4897 = vmatpush3.bf16.msra.mxu1 %v5218_v26  ;;  %v3355_v26 = vrot.slane %v3353_v6, 5 }
 0x1df   : > { %4898 = vmatprep.subr.bf16.mxu1 %v5219_v46 }
 0x1e2   : > { %4899 = vmatpush3.bf16.msra.mxu1 %v5219_v46  ;;  %v3365_v46 = vrot.slane %v3364_v21, 4  ;;  %v3423_v21 = vshll.u32 %v6111_v51, 16 }
 0x1e3   : > { %4900 = vmatprep.subr.bf16.mxu1 %v5220_v47 }
 0x1e4   : > { %v3425_v30 = vrot.slane %v3423_v21, 5 }
 0x1e6   : > { %4901 = vmatpush3.bf16.msra.mxu1 %v5220_v47  ;;  %v3356_v47 = vsel %vm5346_vm4, %v3351_v60, %v3355_v26 }
 0x1e7   : > { %4902 = vmatprep.subr.bf16.mxu1 %v5221_v5 }
 0x1ea   : > { %4903 = vmatpush3.bf16.msra.mxu1 %v5221_v5  ;;  %v3370_v5 = vsel %vm5346_vm4, %v3365_v46, %v3369_v17 }
 0x1eb   : > { %4912 = vmatprep.subr.bf16.mxu1 %v5222_v43  ;;  %v4441_v18 = vcombine.low %v3356_v47, %v3370_v5  ;;  %v6124_v47 = vld [vmem:[#allocation2 + $0x44] sm:$0x1] }
 0x1ec   : > { %v3437_v45 = vshll.u32 %v6124_v47, 16 }
 0x1ed   : > { %4905 = vmatmul.mubr.bf16.vlgmr.msra.gmra.mrb[0].mxu1 %v4386_v38 }
 0x1ee   : > { %4908 = vmatprep.mubr.bf16.mxu1 %v4387_v33  ;;  %4913 = vmatpush3.bf16.msra.mxu1 %v5222_v43  ;;  %v3337_v43 = vld [vmem:[#allocation2 + $0x38] sm:$0xf]  ;;  %v3402_v33 = vrot.slane %v3400_v59, 4  ;;  %v5243_v59 = vld [vmem:[%s6229_s2 + $0x208] sm:$0xff]  }
 0x1ef   : > { %4914 = vmatprep.subr.bf16.mxu1 %v5223_v58  ;;  %v3414_v42 = vshrl.u32 %v3337_v43, 16  ;;  %v3417_v38 = vshll.u32 %v3337_v43, 16 }
 0x1f0   : > { %v3406_v28 = vor.u32 %v3405_v34, %v3402_v33  ;;  %v3639_v34 = vrot.slane %v6078_v39, 5 }
 0x1f2   : > { %4915 = vmatpush3.bf16.msra.mxu1 %v5223_v58  ;;  %v3388_v58 = vrot.slane %v3386_v1, 4  ;;  %v3407_v6 = vrot.slane %v3406_v28, 4  ;;  %v3609_v1 = vld [vmem:[#allocation2 + $0x10] sm:$0xe] }
 0x1f3   : > { %4916 = vmatprep.subr.bf16.mxu1 %v5224_v13 }
 0x1f5   : > { %4909 = vmatmul.mubr.bf16.gmra.mrb[4].mxu1 %v4388_v15  ;;  %v3416_v15 = vrot.slane %v3414_v42, 4  ;;  %v3610_v42 = vld [vmem:[#allocation2 + $0x18] sm:$0xe] }
 0x1f6   : > { %4917 = vmatpush3.bf16.msra.mxu1 %v5224_v13  ;;  %4928 = vmatprep.mubr.bf16.mxu1 %v5225_v22  ;;  %v3442_v13 = vshrl.u32 %v3341_v31, 16  ;;  %v3445_v22 = vshll.u32 %v3341_v31, 16  ;;  %v3635_v31 = vrot.slane %v6076_v36, 5  ;;  %v4454_v33 = vrot.slane %v3610_v42, 9 }
 0x1f7   : > { %4918 = vmatprep.subr.bf16.mxu1 %v5226_v7 }
 0x1f8   : > { %v3447_v35 = vrot.slane %v3445_v22, 5  ;;  %v3612_v22 = vld [vmem:[#allocation2 + $0x28] sm:$0xe] }
 0x1f9   : > { %v4456_v28 = vrot.slane %v3612_v22, 9 }
 0x1fa   : > { %4919 = vmatpush3.bf16.msra.mxu1 %v5226_v7  ;;  %v3419_v7 = vrot.slane %v3417_v38, 5  ;;  %v4453_v38 = vrot.slane %v3609_v1, 9 }
 0x1fb   : > { %4920 = vmatprep.subr.bf16.mxu1 %v5227_v12 }
 0x1fc   : > { %v3420_v24 = vor.u32 %v3419_v7, %v3416_v15  ;;  %v3636_v36 = vsel %vm5743_vm5, %v4453_v38, %v3635_v31  ;;  %v5247_v15 = vld [vmem:[%s6229_s2 + $0x228] sm:$0xff]   ;;  %v5248_v7 = vld [vmem:[%s6229_s2 + $0x230] sm:$0xff]   ;;  %v4489_v38 = vld [vmem:[%s6231_s4 + $0x2] ss:$0 sm:$0xff] }
 0x1fe   : > { %4921 = vmatpush3.bf16.msra.mxu1 %v5227_v12  ;;  %v3392_v12 = vor.u32 %v3391_v32, %v3388_v58  ;;  %v3421_v46 = vrot.slane %v3420_v24, 4  ;;  %v3439_v58 = vrot.slane %v3437_v45, 5  ;;  %v5244_v32 = vld [vmem:[%s6229_s2 + $0x210] sm:$0xff]  }
 0x1ff   : > { %4922 = vmatprep.subr.bf16.mxu1 %v5228_v3 }
 0x200   : > { %v3393_v0 = vrot.slane %v3392_v12, 4  ;;  %v3426_v43 = vsel %vm5346_vm4, %v3421_v46, %v3425_v30  ;;  %v3613_v12 = vld [vmem:[#allocation2 + $0x30] sm:$0xe] }
 0x202   : > { %4923 = vmatpush3.bf16.msra.mxu1 %v5228_v3  ;;  %v6106_v3 = vld [vmem:[#allocation2 + $0x34] sm:$0x1] }
 0x203   : > { %4924 = vmatprep.subr.bf16.mxu1 %v5229_v52  ;;  %v3409_v62 = vshll.u32 %v6106_v3, 16 }
 0x205   : > { %v3411_v26 = vrot.slane %v3409_v62, 5  ;;  %v3651_v62 = vrot.slane %v6106_v3, 5 }
 0x206   : > { %4925 = vmatpush3.bf16.msra.mxu1 %v5229_v52  ;;  %v3431_v52 = vshll.u32 %v3339_v61, 16 }
 0x207   : > { %4926 = vmatprep.subr.bf16.mxu1 %v5230_v11  ;;  %v3412_v8 = vsel %vm5346_vm4, %v3407_v6, %v3411_v26 }
 0x208   : > { %v4443_v44 = vcombine.low %v3412_v8, %v3426_v43 }
 0x20a   : > { %4927 = vmatpush3.bf16.msra.mxu1 %v5230_v11  ;;  %v3395_v11 = vshll.u32 %v6104_v54, 16 }
 0x20b   : > { %4936 = vmatprep.subr.bf16.mxu1 %v5232_v27 }
 0x20c   : > { %v3397_v60 = vrot.slane %v3395_v11, 5  ;;  %v3614_v11 = vld [vmem:[#allocation2 + $0x38] sm:$0xe] }
 0x20d   : > { %4929 = vmatmul.mubr.bf16.vlgmr.msra.gmra.mrb[0].mxu1 %v5231_v4  ;;  %v3430_v4 = vrot.slane %v3428_v49, 4  ;;  %v5249_v49 = vld [vmem:[%s6229_s2 + $0x238] sm:$0xff]  }
 0x20e   : > { %4932 = vmatprep.mubr.bf16.mxu1 %v5233_v41  ;;  %4937 = vmatpush3.bf16.msra.mxu1 %v5232_v27  ;;  %v3444_v27 = vrot.slane %v3442_v13, 4  ;;  %v3379_v41 = vrot.slane %v3378_v16, 4  ;;  %v3398_v5 = vsel %vm5346_vm4, %v3393_v0, %v3397_v60  ;;  %v3640_v13 = vsel %vm5743_vm5, %v4454_v33, %v3639_v34  ;;  %v4490_v33 = vld [vmem:[%s6231_s4 + $0x3] ss:$0 sm:$0xff] }
 0x20f   : > { %4938 = vmatprep.subr.bf16.mxu1 %v5234_v48  ;;  %v4477_v39 = vcombine.low %v3636_v36, %v3640_v13  ;;  %v3647_v16 = vrot.slane %v6104_v54, 5  ;;  %v3615_v54 = vld [vmem:[#allocation2 + $0x40] sm:$0xe] }
 0x210   : > { %v3448_v17 = vor.u32 %v3447_v35, %v3444_v27  ;;  %v3643_v27 = vrot.slane %v6108_v63, 5  ;;  %v4458_v35 = vrot.slane %v3614_v11, 9  ;;  %v4459_v60 = vrot.slane %v3615_v54, 9 }
 0x211   : > { %v3648_v0 = vsel %vm5743_vm5, %v4456_v28, %v3647_v16 }
 0x212   : > { %4939 = vmatpush3.bf16.msra.mxu1 %v5234_v48  ;;  %v3433_v48 = vrot.slane %v3431_v52, 5  ;;  %v3449_v29 = vrot.slane %v3448_v17, 4  ;;  %v3611_v52 = vld [vmem:[#allocation2 + $0x20] sm:$0xe] }
 0x213   : > { %4940 = vmatprep.subr.bf16.mxu1 %v5236_v55  ;;  %v4455_v24 = vrot.slane %v3611_v52, 9 }
 0x215   : > { %4933 = vmatmul.mubr.bf16.gmra.mrb[4].mxu1 %v5235_v50  ;;  %v3383_v50 = vrot.slane %v3381_v23, 5  ;;  %v3655_v23 = vrot.slane %v6111_v51, 5  ;;  %v3644_v3 = vsel %vm5743_vm5, %v4455_v24, %v3643_v27  ;;  %v3659_v51 = vrot.slane %v6124_v47, 5 }
 0x216   : > { %4941 = vmatpush3.bf16.msra.mxu1 %v5236_v55  ;;  %4952 = vmatprep.mubr.bf16.mxu1 %v4441_v18  ;;  %v5242_v55 = vld [vmem:[%s6229_s2 + $0x200] sm:$0xff]   ;;  %v3451_v18 = vshll.u32 %v6119_v10, 16  ;;  %v4478_v6 = vcombine.low %v3644_v3, %v3648_v0 }
 0x217   : > { %4942 = vmatprep.subr.bf16.mxu1 %v5237_v56  ;;  %v3656_v63 = vsel %vm5743_vm5, %v4458_v35, %v3655_v23  ;;  %v3660_v26 = vsel %vm5743_vm5, %v4459_v60, %v3659_v51 }
 0x21a   : > { %4943 = vmatpush3.bf16.msra.mxu1 %v5237_v56  ;;  %v3434_v56 = vor.u32 %v3433_v48, %v3430_v4  ;;  %v3616_v4 = vld [vmem:[#allocation2 + $0x48] sm:$0xe] }
 0x21b   : > { %4944 = vmatprep.subr.bf16.mxu1 %v5238_v53  ;;  %v4460_v21 = vrot.slane %v3616_v4, 9 }
 0x21c   : > { %v3435_v20 = vrot.slane %v3434_v56, 4 }
 0x21e   : > { %4945 = vmatpush3.bf16.msra.mxu1 %v5238_v53  ;;  %v3384_v53 = vsel %vm5346_vm4, %v3379_v41, %v3383_v50  ;;  %v3440_v61 = vsel %vm5346_vm4, %v3435_v20, %v3439_v58  ;;  %v4507_v20 = vld [vmem:[%s6231_s4 + $0x4] ss:$0 sm:$0xff] }
 0x21f   : > { %4946 = vmatprep.subr.bf16.mxu1 %v5239_v25  ;;  %v4442_v2 = vcombine.low %v3384_v53, %v3398_v5 }
 0x222   : > { %4947 = vmatpush3.bf16.msra.mxu1 %v5239_v25  ;;  %v3453_v25 = vrot.slane %v3451_v18, 5 }
 0x223   : > { %4948 = vmatprep.subr.bf16.mxu1 %v5240_v14 }
 0x224   : > { %v3454_v57 = vsel %vm5346_vm4, %v3449_v29, %v3453_v25  ;;  %v6193_v25 = vld [vmem:[%s6231_s4 + $0x5] ss:$0 sm:$0xff] }
 0x225   : > { %v4444_v9 = vcombine.low %v3440_v61, %v3454_v57 }
 0x226   : > { %4949 = vmatpush3.bf16.msra.mxu1 %v5240_v14  ;;  %v5245_v14 = vld [vmem:[%s6229_s2 + $0x218] sm:$0xff]  }
 0x227   : > { %4950 = vmatprep.subr.bf16.mxu1 %v5241_v37 }
 0x22a   : > { %4951 = vmatpush3.bf16.msra.mxu1 %v5241_v37  ;;  %v4457_v37 = vrot.slane %v3613_v12, 9 }
 0x22b   : > { %4960 = vmatprep.subr.bf16.mxu1 %v5242_v55 }
 0x22c   : > { %v3652_v48 = vsel %vm5743_vm5, %v4457_v37, %v3651_v62 }
 0x22d   : > { %4953 = vmatmul.mubr.bf16.vlgmr.msra.gmra.mrb[0].mxu1 %v4442_v2  ;;  %v4479_v41 = vcombine.low %v3652_v48, %v3656_v63 }
 0x22e   : > { %4956 = vmatprep.mubr.bf16.mxu1 %v4443_v44  ;;  %4961 = vmatpush3.bf16.msra.mxu1 %v5242_v55  ;;  %v3663_v55 = vrot.slane %v6119_v10, 5 }
 0x22f   : > { %4962 = vmatprep.subr.bf16.mxu1 %v5243_v59 }
 0x230   : > { %v3664_v46 = vsel %vm5743_vm5, %v4460_v21, %v3663_v55 }
 0x231   : > { %v4480_v17 = vcombine.low %v3660_v26, %v3664_v46 }
 0x232   : > { %4963 = vmatpush3.bf16.msra.mxu1 %v5243_v59 }
 0x233   : > { %4964 = vmatprep.subr.bf16.mxu1 %v5244_v32 }
 0x235   : > { %4957 = vmatmul.mubr.bf16.gmra.mrb[4].mxu1 %v4444_v9 }
 0x236   : > { %4965 = vmatpush3.bf16.msra.mxu1 %v5244_v32  ;;  %4976 = vmatprep.mubr.bf16.mxu1 %v4477_v39 }
 0x237   : > { %4966 = vmatprep.subr.bf16.mxu1 %v5245_v14 }
 0x23a   : > { %4967 = vmatpush3.bf16.msra.mxu1 %v5245_v14 }
 0x23b   : > { %4968 = vmatprep.subr.bf16.mxu1 %v5246_v40 }
 0x23e   : > { %4969 = vmatpush3.bf16.msra.mxu1 %v5246_v40 }
 0x23f   : > { %4970 = vmatprep.subr.bf16.mxu1 %v5247_v15 }
 0x242   : > { %4971 = vmatpush3.bf16.msra.mxu1 %v5247_v15 }
 0x243   : > { %4972 = vmatprep.subr.bf16.mxu1 %v5248_v7 }
 0x246   : > { %4973 = vmatpush3.bf16.msra.mxu1 %v5248_v7 }
 0x247   : > { %4974 = vmatprep.subr.bf16.mxu1 %v5249_v49 }
 0x24a   : > { %4975 = vmatpush3.bf16.msra.mxu1 %v5249_v49 }
 0x24d   : > { %4977 = vmatmul.mubr.bf16.vlgmr.msra.gmra.mrb[0].mxu1 %v4478_v6 }
 0x24e   : > { %4980 = vmatprep.mubr.bf16.mxu1 %v4479_v41 }
 0x255   : > { %4981 = vmatmul.mubr.bf16.gmra.mrb[4].mxu1 %v4480_v17 }
 0x28a   : > { %v4810_v50 = vpop.f32.mrb[8].mxu0 }
 0x28b   : > { %v2250_v5 = vpop.f32.mrb[9].mxu0 }
 0x28c   : > { %v4811_v56 = vpop.f32.mrb[10].mxu0 }
 0x28d   : > { %v2253_v18 = vpop.f32.mrb[11].mxu0 }
 0x292   : > { %v4814_v8 = vpop.f32.mrb[12].mxu0 }
 0x293   : > { %v2266_v30 = vpop.f32.mrb[13].mxu0 }
 0x294   : > { %v4815_v53 = vpop.f32.mrb[14].mxu0 }
 0x295   : > { %v6185_v47 = vpop.f32.mrb[15].mxu0 }
 0x29a   : > { %v4988_v10 = vpop.f32.mrb[16].mxu0 }
 0x29b   : > { %v3923_v45 = vpop.f32.mrb[17].mxu0  ;;  %v3961_v29 = vmul.f32 %v4988_v10, %v4507_v20 }
 0x29c   : > { %v4989_v1 = vpop.f32.mrb[18].mxu0  ;;  %v3959_v31 = vmul.f32 %v4507_v20, %v3923_v45 }
 0x29d   : > { %v3926_v2 = vpop.f32.mrb[19].mxu0  ;;  %v3974_v57 = vadd.f32 %v6193_v25, %v3961_v29  ;;  %v3962_v9 = vmul.f32 %v4989_v1, %v4507_v20 }
 0x29e   : > { %v3972_v39 = vadd.f32 %v6193_v25, %v3959_v31  ;;  %v3960_v15 = vmul.f32 %v4507_v20, %v3926_v2 }
 0x29f   : > { %v3975_v11 = vadd.f32 %v6193_v25, %v3962_v9 }
 0x2a0   : > { %v3973_v27 = vadd.f32 %v6193_v25, %v3960_v15 }
 0x2a2   : > { %v4992_v43 = vpop.f32.mrb[20].mxu0 }
 0x2a3   : > { %v3939_v59 = vpop.f32.mrb[21].mxu0  ;;  %v3965_v49 = vmul.f32 %v4992_v43, %v4507_v20 }
 0x2a4   : > { %v4993_v44 = vpop.f32.mrb[22].mxu0  ;;  %v3963_v62 = vmul.f32 %v4507_v20, %v3939_v59 }
 0x2a5   : > { %v3942_v19 = vpop.f32.mrb[23].mxu0  ;;  %v3978_v48 = vadd.f32 %v6193_v25, %v3965_v49  ;;  %v3966_v41 = vmul.f32 %v4993_v44, %v4507_v20 }
 0x2a6   : > { %v3976_v26 = vadd.f32 %v6193_v25, %v3963_v62 }
 0x320   : > { %v4978_v42 = vpop.f32.mrb[0].mxu1 }
 0x321   : > { %v4994_v58 = vadd.f32 %v4978_v42, %v4810_v50  ;;  %v3780_v32 = vpop.f32.mrb[1].mxu1 }
 0x322   : > { %v4995_v34 = vadd.f32 %v3780_v32, %v2250_v5  ;;  %v4979_v61 = vpop.f32.mrb[2].mxu1 }
 0x323   : > { %v3826_v36 = vmul.f32 %v4994_v58, %v4489_v38  ;;  %v4996_v13 = vadd.f32 %v4979_v61, %v4811_v56  ;;  %v3783_v14 = vpop.f32.mrb[3].mxu1  ;;  %v3964_v56 = vmul.f32 %v4507_v20, %v3942_v19 }
 0x324   : > { %v3824_v40 = vmul.f32 %v4995_v34, %v4489_v38  ;;  %v4997_v7 = vadd.f32 %v3783_v14, %v2253_v18 }
 0x325   : > { %v3839_v22 = vadd.f32 %v4490_v33, %v3826_v36  ;;  %v3827_v12 = vmul.f32 %v4996_v13, %v4489_v38  ;;  %v3977_v59 = vadd.f32 %v6193_v25, %v3964_v56 }
 0x326   : > { %v3837_v52 = vadd.f32 %v4490_v33, %v3824_v40  ;;  %v3825_v28 = vmul.f32 %v4997_v7, %v4489_v38 }
 0x327   : > { %v3982_v16 = vadd.f32 %v3974_v57, %v3839_v22  ;;  %v3840_v37 = vadd.f32 %v4490_v33, %v3827_v12 }
 0x328   : > { %v3980_v24 = vadd.f32 %v3972_v39, %v3837_v52  ;;  %v3838_v35 = vadd.f32 %v4490_v33, %v3825_v28  ;;  %v4982_v23 = vpop.f32.mrb[4].mxu1 }
 0x329   : > { %v3990_v0 = vmax.f32 %v3982_v16, 0.0  ;;  %v3983_v4 = vadd.f32 %v3975_v11, %v3840_v37  ;;  %v4998_v54 = vadd.f32 %v4982_v23, %v4814_v8  ;;  %v3796_v3 = vpop.f32.mrb[5].mxu1 }
 0x32a   : > { %v3988_v6 = vmax.f32 %v3980_v24, 0.0  ;;  %v3981_v63 = vadd.f32 %v3973_v27, %v3838_v35  ;;  %v4999_v21 = vadd.f32 %v3796_v3, %v2266_v30  ;;  %v4983_v60 = vpop.f32.mrb[6].mxu1 }
 0x32b   : > { %3998 = vst [vmem:[%s6208_s23 + $0x10] sm:$0xff] %v3990_v0  ;;  %v3991_v51 = vmax.f32 %v3983_v4, 0.0  ;;  %v3830_v55 = vmul.f32 %v4998_v54, %v4489_v38  ;;  %v5000_v46 = vadd.f32 %v4983_v60, %v4815_v53  ;;  %v3799_v17 = vpop.f32.mrb[7].mxu1  ;;  %v3979_v53 = vadd.f32 %v6193_v25, %v3966_v41 }
 0x32c   : > { %3996 = vst [vmem:[%s6208_s23] sm:$0xff] %v3988_v6  ;;  %v3989_v50 = vmax.f32 %v3981_v63, 0.0  ;;  %v3828_v5 = vmul.f32 %v4999_v21, %v4489_v38  ;;  %v5001_v18 = vadd.f32 %v3799_v17, %v6185_v47 }
 0x32d   : > { %3999 = vst [vmem:[%s6208_s23 + $0x18] sm:$0xff] %v3991_v51  ;;  %v3843_v8 = vadd.f32 %v4490_v33, %v3830_v55  ;;  %v3831_v30 = vmul.f32 %v5000_v46, %v4489_v38 }
 0x32e   : > { %3997 = vst [vmem:[%s6208_s23 + $0x8] sm:$0xff] %v3989_v50  ;;  %v3841_v10 = vadd.f32 %v4490_v33, %v3828_v5  ;;  %v3829_v45 = vmul.f32 %v5001_v18, %v4489_v38 }
 0x32f   : > { %v3986_v1 = vadd.f32 %v3978_v48, %v3843_v8  ;;  %v3844_v2 = vadd.f32 %v4490_v33, %v3831_v30 }
 0x330   : > { %v3984_v43 = vadd.f32 %v3976_v26, %v3841_v10  ;;  %v3842_v44 = vadd.f32 %v4490_v33, %v3829_v45 }
 0x331   : > { %v3994_v19 = vmax.f32 %v3986_v1, 0.0  ;;  %v3987_v47 = vadd.f32 %v3979_v53, %v3844_v2 }
 0x332   : > { %v3992_v20 = vmax.f32 %v3984_v43, 0.0  ;;  %v3985_v29 = vadd.f32 %v3977_v59, %v3842_v44 }
 0x333   : > { %4002 = vst [vmem:[%s6208_s23 + $0x30] sm:$0xff] %v3994_v19  ;;  %v3995_v42 = vmax.f32 %v3987_v47, 0.0 }
 0x334   : > { %4000 = vst [vmem:[%s6208_s23 + $0x20] sm:$0xff] %v3992_v20  ;;  %v3993_v31 = vmax.f32 %v3985_v29, 0.0 }
 0x335   : > { %4003 = vst [vmem:[%s6208_s23 + $0x38] sm:$0xff] %v3995_v42 }
 0x336   : > { %4001 = vst [vmem:[%s6208_s23 + $0x28] sm:$0xff] %v3993_v31 }
 0x337 PF: > { %s15_s18 = sadd.s32 1, %s5260_s18  }
 0x338   : > { %p12_p4 = scmp.ge.s32.totalorder %s15_s18, 4  }
 0x33a   :  { %14 = sbr.rel (!%p12_p4) target bundleno = 1 (0x1), region = 93 }

</bundles_post_ra>
